<compile_context>
chip_gen: v6e
topology: v6e:2x2x1
jax: 0.10.0
libtpu: 0.0.40
codegen_flags: <defaults>
</compile_context>

<pallas_src>
import functools

import jax
import jax.numpy as jnp
from jax import lax
from jax.experimental import pallas as pl
from jax.experimental.pallas import tpu as pltpu


def _make_conv_kernel(w_pad: int, l_out: int):
    """Kernel body for a given padded row stride (W+2) and flat output length."""

    def kernel(x_ref, w_ref, o_ref):
        # x_ref: (1, tc, Lp)    flattened zero-padded input plane (lanes = pixels)
        # w_ref: (9, tc, 2)     per-tap weights, [tap, in_channel, out_channel]
        # o_ref: (1, 2, l_out)  flattened output plane (lanes = pixels)
        @pl.when(pl.program_id(1) == 0)
        def _init():
            o_ref[...] = jnp.zeros_like(o_ref)

        acc = jnp.zeros((2, l_out), jnp.float32)
        for dh in range(3):
            for dw in range(3):
                off = dh * w_pad + dw                     # static lane offset
                x_tap = x_ref[0, :, off:off + l_out]      # (tc, l_out)
                w_tap = w_ref[dh * 3 + dw]                # (tc, 2)
                acc = acc + lax.dot_general(
                    w_tap, x_tap,
                    dimension_numbers=(((0,), (0,)), ((), ())),
                    precision=lax.Precision.HIGHEST,
                    preferred_element_type=jnp.float32)

        o_ref[0] = o_ref[0] + acc.astype(o_ref.dtype)

    return kernel


def _pick_tile_c(C: int, lp: int, max_in_bytes: int = 6 * 2**20):
    """Channel tile (multiple of 8) so one input block stays under the budget."""
    cp0 = -(-C // 8) * 8
    tc = max(8, (max_in_bytes // (lp * 4)) // 8 * 8)
    tc = min(cp0, tc)
    num_c = -(-cp0 // tc)
    return tc, num_c


@functools.partial(jax.jit, static_argnames=("tile_c",))
def depth_predict_forward(x, weights, tile_c=None):
    """x: (N, C, H, W) f32; weights: (2, C, 3, 3) f32 (conv3, conv4 stacked).

    Returns ({'predict_depth': (N,H,W), 'predict_bc': (N,H,W)}, x1=(N,1,H,W)),
    matching DEPTH_predict_layer.forward.
    """
    N, C, H, W = x.shape
    w_pad = W + 2
    lp = (H + 3) * w_pad          # +1 conv border top/bottom, +1 extra bottom row
    l_out = H * w_pad             # flat output length (incl. 2 junk cols per row)

    if tile_c is None:
        tc, num_c = _pick_tile_c(C, lp)
    else:
        cp0 = -(-C // 8) * 8
        tc = min(cp0, max(8, -(-int(tile_c) // 8) * 8))
        num_c = -(-cp0 // tc)
    cp = tc * num_c

    # Single zero-pad: channels -> cp, 1-px conv border, +1 extra bottom row so
    # the dh=2,dw=2 tap's 2-element flat overrun stays in bounds.
    xp = jnp.pad(x, ((0, 0), (0, cp - C), (1, 2), (1, 1)))
    xp = xp.reshape(N, cp, lp)                     # contiguous reshape (free)

    # Weights (2, C, 3, 3) -> (9, cp, 2): [tap, in_channel, out_channel].
    w9 = jnp.transpose(weights, (2, 3, 1, 0)).reshape(9, C, 2)
    w9 = jnp.pad(w9, ((0, 0), (0, cp - C), (0, 0)))

    blk_bytes = (tc * lp + 9 * tc * 2 + 2 * l_out) * 4
    vmem_limit = int(min(40 * 2**20, max(16 * 2**20, 4 * blk_bytes)))

    out = pl.pallas_call(
        _make_conv_kernel(w_pad, l_out),
        out_shape=jax.ShapeDtypeStruct((N, 2, l_out), x.dtype),
        grid=(N, num_c),
        in_specs=[
            pl.BlockSpec((1, tc, lp), lambda n, c: (n, c, 0)),
            pl.BlockSpec((9, tc, 2), lambda n, c: (0, c, 0)),
        ],
        out_specs=pl.BlockSpec((1, 2, l_out), lambda n, c: (n, 0, 0)),
        compiler_params=pltpu.CompilerParams(
            dimension_semantics=("parallel", "arbitrary"),
            vmem_limit_bytes=vmem_limit),
    )(xp, w9)

    # (N, 2, H*(W+2)) -> (N, 2, H, W): free reshape + drop the 2 junk columns.
    y = out.reshape(N, 2, H, w_pad)[:, :, :, :W]
    x1 = y[:, 0:1, :, :]                           # conv3 output, (N, 1, H, W)
    return {"predict_depth": y[:, 0], "predict_bc": y[:, 1]}, x1


def _reference_forward(x, weights):
    # Pure-JAX reference: lax.conv (NCHW / OIHW), padding=1, no bias, f32 precision.
    dn = lax.conv_dimension_numbers(x.shape, weights.shape, ("NCHW", "OIHW", "NCHW"))
    y = lax.conv_general_dilated(
        x, weights, window_strides=(1, 1), padding=((1, 1), (1, 1)),
        dimension_numbers=dn, precision=lax.Precision.HIGHEST)
    x1 = y[:, 0:1]
    return {"predict_depth": y[:, 0], "predict_bc": y[:, 1]}, x1


def _check(ret, x1, ret_ref, x1_ref, shape):
    N, _, H, W = shape
    tol = dict(atol=1e-3, rtol=1e-3)
    assert ret["predict_depth"].shape == (N, H, W)
    assert ret["predict_bc"].shape == (N, H, W)
    assert x1.shape == (N, 1, H, W)
    assert jnp.allclose(ret["predict_depth"], ret_ref["predict_depth"], **tol)
    assert jnp.allclose(ret["predict_bc"], ret_ref["predict_bc"], **tol)
    assert jnp.allclose(x1, x1_ref, **tol)


if __name__ == "__main__":
    key = jax.random.PRNGKey(0)

    # Case 1: the module's nominal small shape (single channel tile).
    N, C, H, W = 2, 4, 16, 16
    kx, kw3, kw4, kx2, kw = jax.random.split(key, 5)
    x = jax.random.normal(kx, (N, C, H, W), dtype=jnp.float32)
    w_conv3 = jax.random.normal(kw3, (1, C, 3, 3), dtype=jnp.float32) * 0.1
    w_conv4 = jax.random.normal(kw4, (1, C, 3, 3), dtype=jnp.float32) * 0.1
    weights = jnp.concatenate([w_conv3, w_conv4], axis=0)   # (2, C, 3, 3)

    ret, x1 = depth_predict_forward(x, weights)
    jax.block_until_ready((ret, x1))
    ret_ref, x1_ref = _reference_forward(x, weights)
    _check(ret, x1, ret_ref, x1_ref, (N, C, H, W))

    # Case 2: more channels + forced channel tiling (exercises the c-axis
    # accumulation path: tile_c=8 -> two channel tiles).
    C2 = 16
    x2 = jax.random.normal(kx2, (N, C2, H, W), dtype=jnp.float32)
    weights2 = jax.random.normal(kw, (2, C2, 3, 3), dtype=jnp.float32) * 0.1
    ret2, x1_2 = depth_predict_forward(x2, weights2, tile_c=8)
    jax.block_until_ready((ret2, x1_2))
    ret2_ref, x1_2_ref = _reference_forward(x2, weights2)
    _check(ret2, x1_2, ret2_ref, x1_2_ref, (N, C2, H, W))

    print("KERNEL_OK")
</pallas_src>

<mosaic_0001>
module attributes {stable_mosaic.version = 11 : i64} {
  func.func @kernel(%arg0: i32, %arg1: i32, %arg2: memref<1x8x342xf32, #tpu.memory_space<vmem>>, %arg3: memref<9x8x2xf32, #tpu.memory_space<vmem>>, %arg4: memref<1x2x288xf32, #tpu.memory_space<vmem>>) attributes {dimension_semantics = [#tpu.dimension_semantics<parallel>, #tpu.dimension_semantics<arbitrary>], iteration_bounds = array<i64: 2, 1>, scalar_prefetch = 0 : i64, scratch_operands = 0 : i64, tpu.core_type = #tpu.core_type<tc>, window_params = [{transform_indices = @transform_0, window_bounds = array<i64: 1, 8, 342>}, {transform_indices = @transform_1, window_bounds = array<i64: 9, 8, 2>}, {transform_indices = @transform_2, window_bounds = array<i64: 1, 2, 288>}]} {
    %c0_i32 = arith.constant 0 : i32
    %0 = arith.cmpi eq, %arg1, %c0_i32 : i32
    %1 = arith.extui %0 : i1 to i32
    %c0_i32_0 = arith.constant 0 : i32
    %2 = arith.cmpi ne, %1, %c0_i32_0 : i32
    scf.if %2 {
      %cst_55 = arith.constant 0.000000e+00 : f32
      %64 = vector.broadcast %cst_55 : f32 to vector<1x2x288xf32>
      %c0_56 = arith.constant 0 : index
      %c0_57 = arith.constant 0 : index
      %c0_58 = arith.constant 0 : index
      %65 = vector.load %arg4[%c0_56, %c0_57, %c0_58] : memref<1x2x288xf32, #tpu.memory_space<vmem>>, vector<1x2x288xf32>
      tpu.vector_store %arg4[%c0_56, %c0_57, %c0_58], %64 {strides = array<i32>} : memref<1x2x288xf32, #tpu.memory_space<vmem>>, vector<1x2x288xf32>,
    } else {
    }
    %cst = arith.constant 0.000000e+00 : f32
    %3 = vector.broadcast %cst : f32 to vector<2x288xf32>
    %c0 = arith.constant 0 : index
    %c0_1 = arith.constant 0 : index
    %c0_2 = arith.constant 0 : index
    %4 = vector.load %arg2[%c0, %c0_1, %c0_2] : memref<1x8x342xf32, #tpu.memory_space<vmem>>, vector<1x8x288xf32>
    %5 = vector.shape_cast %4 : vector<1x8x288xf32> to vector<8x288xf32>
    %c0_3 = arith.constant 0 : index
    %c0_4 = arith.constant 0 : index
    %c0_5 = arith.constant 0 : index
    %6 = vector.load %arg3[%c0_3, %c0_4, %c0_5] : memref<9x8x2xf32, #tpu.memory_space<vmem>>, vector<1x8x2xf32>
    %7 = vector.shape_cast %6 : vector<1x8x2xf32> to vector<8x2xf32>
    %cst_6 = arith.constant dense<0.000000e+00> : vector<2x288xf32>
    %8 = tpu.matmul %7, %5, %cst_6 {dimension_numbers = #tpu.dot_dimension_numbers<[0], [0], [1], [1], [0, 1, 1, 1], [], []>, precision = #tpu.contract_precision<fp32>} : vector<8x2xf32>, vector<8x288xf32>, vector<2x288xf32> -> vector<2x288xf32>
    %9 = arith.addf %3, %8 : vector<2x288xf32>
    %c0_7 = arith.constant 0 : index
    %c0_8 = arith.constant 0 : index
    %c1 = arith.constant 1 : index
    %10 = vector.load %arg2[%c0_7, %c0_8, %c1] : memref<1x8x342xf32, #tpu.memory_space<vmem>>, vector<1x8x288xf32>
    %11 = vector.shape_cast %10 : vector<1x8x288xf32> to vector<8x288xf32>
    %c1_9 = arith.constant 1 : index
    %c0_10 = arith.constant 0 : index
    %c0_11 = arith.constant 0 : index
    %12 = vector.load %arg3[%c1_9, %c0_10, %c0_11] : memref<9x8x2xf32, #tpu.memory_space<vmem>>, vector<1x8x2xf32>
    %13 = vector.shape_cast %12 : vector<1x8x2xf32> to vector<8x2xf32>
    %cst_12 = arith.constant dense<0.000000e+00> : vector<2x288xf32>
    %14 = tpu.matmul %13, %11, %cst_12 {dimension_numbers = #tpu.dot_dimension_numbers<[0], [0], [1], [1], [0, 1, 1, 1], [], []>, precision = #tpu.contract_precision<fp32>} : vector<8x2xf32>, vector<8x288xf32>, vector<2x288xf32> -> vector<2x288xf32>
    %15 = arith.addf %9, %14 : vector<2x288xf32>
    %c0_13 = arith.constant 0 : index
    %c0_14 = arith.constant 0 : index
    %c2 = arith.constant 2 : index
    %16 = vector.load %arg2[%c0_13, %c0_14, %c2] : memref<1x8x342xf32, #tpu.memory_space<vmem>>, vector<1x8x288xf32>
    %17 = vector.shape_cast %16 : vector<1x8x288xf32> to vector<8x288xf32>
    %c2_15 = arith.constant 2 : index
    %c0_16 = arith.constant 0 : index
    %c0_17 = arith.constant 0 : index
    %18 = vector.load %arg3[%c2_15, %c0_16, %c0_17] : memref<9x8x2xf32, #tpu.memory_space<vmem>>, vector<1x8x2xf32>
    %19 = vector.shape_cast %18 : vector<1x8x2xf32> to vector<8x2xf32>
    %cst_18 = arith.constant dense<0.000000e+00> : vector<2x288xf32>
    %20 = tpu.matmul %19, %17, %cst_18 {dimension_numbers = #tpu.dot_dimension_numbers<[0], [0], [1], [1], [0, 1, 1, 1], [], []>, precision = #tpu.contract_precision<fp32>} : vector<8x2xf32>, vector<8x288xf32>, vector<2x288xf32> -> vector<2x288xf32>
    %21 = arith.addf %15, %20 : vector<2x288xf32>
    %c0_19 = arith.constant 0 : index
    %c0_20 = arith.constant 0 : index
    %c18 = arith.constant 18 : index
    %22 = vector.load %arg2[%c0_19, %c0_20, %c18] : memref<1x8x342xf32, #tpu.memory_space<vmem>>, vector<1x8x288xf32>
    %23 = vector.shape_cast %22 : vector<1x8x288xf32> to vector<8x288xf32>
    %c3 = arith.constant 3 : index
    %c0_21 = arith.constant 0 : index
    %c0_22 = arith.constant 0 : index
    %24 = vector.load %arg3[%c3, %c0_21, %c0_22] : memref<9x8x2xf32, #tpu.memory_space<vmem>>, vector<1x8x2xf32>
    %25 = vector.shape_cast %24 : vector<1x8x2xf32> to vector<8x2xf32>
    %cst_23 = arith.constant dense<0.000000e+00> : vector<2x288xf32>
    %26 = tpu.matmul %25, %23, %cst_23 {dimension_numbers = #tpu.dot_dimension_numbers<[0], [0], [1], [1], [0, 1, 1, 1], [], []>, precision = #tpu.contract_precision<fp32>} : vector<8x2xf32>, vector<8x288xf32>, vector<2x288xf32> -> vector<2x288xf32>
    %27 = arith.addf %21, %26 : vector<2x288xf32>
    %c0_24 = arith.constant 0 : index
    %c0_25 = arith.constant 0 : index
    %c19 = arith.constant 19 : index
    %28 = vector.load %arg2[%c0_24, %c0_25, %c19] : memref<1x8x342xf32, #tpu.memory_space<vmem>>, vector<1x8x288xf32>
    %29 = vector.shape_cast %28 : vector<1x8x288xf32> to vector<8x288xf32>
    %c4 = arith.constant 4 : index
    %c0_26 = arith.constant 0 : index
    %c0_27 = arith.constant 0 : index
    %30 = vector.load %arg3[%c4, %c0_26, %c0_27] : memref<9x8x2xf32, #tpu.memory_space<vmem>>, vector<1x8x2xf32>
    %31 = vector.shape_cast %30 : vector<1x8x2xf32> to vector<8x2xf32>
    %cst_28 = arith.constant dense<0.000000e+00> : vector<2x288xf32>
    %32 = tpu.matmul %31, %29, %cst_28 {dimension_numbers = #tpu.dot_dimension_numbers<[0], [0], [1], [1], [0, 1, 1, 1], [], []>, precision = #tpu.contract_precision<fp32>} : vector<8x2xf32>, vector<8x288xf32>, vector<2x288xf32> -> vector<2x288xf32>
    %33 = arith.addf %27, %32 : vector<2x288xf32>
    %c0_29 = arith.constant 0 : index
    %c0_30 = arith.constant 0 : index
    %c20 = arith.constant 20 : index
    %34 = vector.load %arg2[%c0_29, %c0_30, %c20] : memref<1x8x342xf32, #tpu.memory_space<vmem>>, vector<1x8x288xf32>
    %35 = vector.shape_cast %34 : vector<1x8x288xf32> to vector<8x288xf32>
    %c5 = arith.constant 5 : index
    %c0_31 = arith.constant 0 : index
    %c0_32 = arith.constant 0 : index
    %36 = vector.load %arg3[%c5, %c0_31, %c0_32] : memref<9x8x2xf32, #tpu.memory_space<vmem>>, vector<1x8x2xf32>
    %37 = vector.shape_cast %36 : vector<1x8x2xf32> to vector<8x2xf32>
    %cst_33 = arith.constant dense<0.000000e+00> : vector<2x288xf32>
    %38 = tpu.matmul %37, %35, %cst_33 {dimension_numbers = #tpu.dot_dimension_numbers<[0], [0], [1], [1], [0, 1, 1, 1], [], []>, precision = #tpu.contract_precision<fp32>} : vector<8x2xf32>, vector<8x288xf32>, vector<2x288xf32> -> vector<2x288xf32>
    %39 = arith.addf %33, %38 : vector<2x288xf32>
    %c0_34 = arith.constant 0 : index
    %c0_35 = arith.constant 0 : index
    %c36 = arith.constant 36 : index
    %40 = vector.load %arg2[%c0_34, %c0_35, %c36] : memref<1x8x342xf32, #tpu.memory_space<vmem>>, vector<1x8x288xf32>
    %41 = vector.shape_cast %40 : vector<1x8x288xf32> to vector<8x288xf32>
    %c6 = arith.constant 6 : index
    %c0_36 = arith.constant 0 : index
    %c0_37 = arith.constant 0 : index
    %42 = vector.load %arg3[%c6, %c0_36, %c0_37] : memref<9x8x2xf32, #tpu.memory_space<vmem>>, vector<1x8x2xf32>
    %43 = vector.shape_cast %42 : vector<1x8x2xf32> to vector<8x2xf32>
    %cst_38 = arith.constant dense<0.000000e+00> : vector<2x288xf32>
    %44 = tpu.matmul %43, %41, %cst_38 {dimension_numbers = #tpu.dot_dimension_numbers<[0], [0], [1], [1], [0, 1, 1, 1], [], []>, precision = #tpu.contract_precision<fp32>} : vector<8x2xf32>, vector<8x288xf32>, vector<2x288xf32> -> vector<2x288xf32>
    %45 = arith.addf %39, %44 : vector<2x288xf32>
    %c0_39 = arith.constant 0 : index
    %c0_40 = arith.constant 0 : index
    %c37 = arith.constant 37 : index
    %46 = vector.load %arg2[%c0_39, %c0_40, %c37] : memref<1x8x342xf32, #tpu.memory_space<vmem>>, vector<1x8x288xf32>
    %47 = vector.shape_cast %46 : vector<1x8x288xf32> to vector<8x288xf32>
    %c7 = arith.constant 7 : index
    %c0_41 = arith.constant 0 : index
    %c0_42 = arith.constant 0 : index
    %48 = vector.load %arg3[%c7, %c0_41, %c0_42] : memref<9x8x2xf32, #tpu.memory_space<vmem>>, vector<1x8x2xf32>
    %49 = vector.shape_cast %48 : vector<1x8x2xf32> to vector<8x2xf32>
    %cst_43 = arith.constant dense<0.000000e+00> : vector<2x288xf32>
    %50 = tpu.matmul %49, %47, %cst_43 {dimension_numbers = #tpu.dot_dimension_numbers<[0], [0], [1], [1], [0, 1, 1, 1], [], []>, precision = #tpu.contract_precision<fp32>} : vector<8x2xf32>, vector<8x288xf32>, vector<2x288xf32> -> vector<2x288xf32>
    %51 = arith.addf %45, %50 : vector<2x288xf32>
    %c0_44 = arith.constant 0 : index
    %c0_45 = arith.constant 0 : index
    %c38 = arith.constant 38 : index
    %52 = vector.load %arg2[%c0_44, %c0_45, %c38] : memref<1x8x342xf32, #tpu.memory_space<vmem>>, vector<1x8x288xf32>
    %53 = vector.shape_cast %52 : vector<1x8x288xf32> to vector<8x288xf32>
    %c8 = arith.constant 8 : index
    %c0_46 = arith.constant 0 : index
    %c0_47 = arith.constant 0 : index
    %54 = vector.load %arg3[%c8, %c0_46, %c0_47] : memref<9x8x2xf32, #tpu.memory_space<vmem>>, vector<1x8x2xf32>
    %55 = vector.shape_cast %54 : vector<1x8x2xf32> to vector<8x2xf32>
    %cst_48 = arith.constant dense<0.000000e+00> : vector<2x288xf32>
    %56 = tpu.matmul %55, %53, %cst_48 {dimension_numbers = #tpu.dot_dimension_numbers<[0], [0], [1], [1], [0, 1, 1, 1], [], []>, precision = #tpu.contract_precision<fp32>} : vector<8x2xf32>, vector<8x288xf32>, vector<2x288xf32> -> vector<2x288xf32>
    %57 = arith.addf %51, %56 : vector<2x288xf32>
    %c0_49 = arith.constant 0 : index
    %c0_50 = arith.constant 0 : index
    %c0_51 = arith.constant 0 : index
    %58 = vector.load %arg4[%c0_49, %c0_50, %c0_51] : memref<1x2x288xf32, #tpu.memory_space<vmem>>, vector<1x2x288xf32>
    %59 = vector.shape_cast %58 : vector<1x2x288xf32> to vector<2x288xf32>
    %60 = arith.addf %59, %57 : vector<2x288xf32>
    %c0_52 = arith.constant 0 : index
    %c0_53 = arith.constant 0 : index
    %c0_54 = arith.constant 0 : index
    %61 = vector.load %arg4[%c0_52, %c0_53, %c0_54] : memref<1x2x288xf32, #tpu.memory_space<vmem>>, vector<1x2x288xf32>
    %62 = vector.shape_cast %61 : vector<1x2x288xf32> to vector<2x288xf32>
    %63 = vector.shape_cast %60 : vector<2x288xf32> to vector<1x2x288xf32>
    tpu.vector_store %arg4[%c0_52, %c0_53, %c0_54], %63 {strides = array<i32>} : memref<1x2x288xf32, #tpu.memory_space<vmem>>, vector<1x2x288xf32>,
    return
  }
  func.func @transform_0(%arg0: i32, %arg1: i32) -> (i32, i32, i32) {
    %c0_i32 = arith.constant 0 : i32
    %c0_i32_0 = arith.constant 0 : i32
    return %arg0, %arg1, %c0_i32 : i32, i32, i32
  }
  func.func @transform_1(%arg0: i32, %arg1: i32) -> (i32, i32, i32) {
    %c0_i32 = arith.constant 0 : i32
    %c0_i32_0 = arith.constant 0 : i32
    %c0_i32_1 = arith.constant 0 : i32
    return %c0_i32, %arg1, %c0_i32_0 : i32, i32, i32
  }
  func.func @transform_2(%arg0: i32, %arg1: i32) -> (i32, i32, i32) {
    %c0_i32 = arith.constant 0 : i32
    %c0_i32_0 = arith.constant 0 : i32
    %c0_i32_1 = arith.constant 0 : i32
    return %arg0, %c0_i32, %c0_i32_0 : i32, i32, i32
  }
}

</mosaic_0001>

<bundles_post_ra>
// kernel: depth_predict_forward.1
= control target key start
LH: loop header
LB: loop body
LE: loop exit
PB: predicated region body
PF: predicated region fallthrough
CT: control target
= control target key end

     0   :  { %s9451_s9 = smov 0   ;;  %s9453_s10 = smov 0   ;;  %s10376_s0 = inlined_call_operand.vmem [shape: f32[2,8,342], index: 0, kind: input, shape index: {}]   ;;  %s10377_s1 = inlined_call_operand.vmem [shape: f32[9,8,2], index: 1, kind: input, shape index: {}]   ;;  %s10378_s2 = inlined_call_operand.vmem [shape: f32[2,2,288], index: 2, kind: output, shape index: {}]  }
   0x1   :  { %s9455_s11 = smov 0  }
   0x2 LB: > { %s24_s12 = sadd.s32 1, %s9419_s10  ;;  %p8973_p0 = scmp.ge.s32.totalorder %s9423_s11, 1  ;;  %s9423_s11 = sphi %s9455_s11, %s12_s11   ;;  %s9419_s10 = sphi %s9453_s10, %s10382_s10   ;;  %s9415_s9 = sphi %s9451_s9, %s10381_s9  }
   0x3   : > { %p26_p1 = scmp.ge.s32.totalorder %s24_s12, 2  ;;  %p139_p2 = scmp.lt.s32.totalorder %s9423_s11, 3 }
   0x5   : > { %s10384_s12 = smov (%p26_p1, %s24_s12), 0  ;;  %p140_p3 = pnand %p8973_p0, %p139_p2 }
   0x6   : > { %p169_p4 = scmp.lt.s32.totalorder (!%p140_p3), %s9415_s9, 1  ;;  %s9425_s17 = smov (!%p140_p3), 127  }
   0x7   : > { %143 = sbr.rel (%p140_p3) target bundleno = 633 (0x279), region = 28  ;;  %s9427_s26 = smov (!%p140_p3), 126  }
   0x8   : > { %s9428_s27 = smov (!%p140_p3), 110   ;;  %s9429_s28 = smov (!%p140_p3), 109  }
   0x9   : > { %s9430_s29 = smov (!%p140_p3), 108   ;;  %s9431_s30 = smov (!%p140_p3), 92  }
   0xa   : > { %s9432_s7 = smov (!%p140_p3), 91   ;;  %s9434_s8 = smov (!%p140_p3), 90  }
   0xc   : > { %s10386_s9 = smov (!%p169_p4, %s9415_s9), 1  ;;  %v200_v3 = vld [vmem:[%s10377_s1] sm:$0xff]  ;;  %v8978_v4 = vld [vmem:[%s10377_s1 + $0x18] sm:$0xff]  ;;  %v8976_v5 = vld [vmem:[%s10377_s1 + $0x8] sm:$0xff]  ;;  %v9426_v6 = vmov 0.0   ;;  %vm244_vm0 = vcmask 1039360  }
   0xd   : > { %s9364_s13 = smul.u32 24, %s10386_s9  ;;  %406 = vmatprep.mubr.f32.mxu1 %v9426_v6  ;;  %320 = vmatprep.mubr.f32.mxu0 %v9426_v6  ;;  %v8977_v7 = vld [vmem:[%s10377_s1 + $0x10] sm:$0xff]  ;;  %v8979_v16 = vld [vmem:[%s10377_s1 + $0x20] sm:$0xff]  ;;  %v8980_v24 = vld [vmem:[%s10377_s1 + $0x28] sm:$0xff]  ;;  %vm250_vm1 = vcmask 64512   ;;  %vm9433_vm2 = vmmov 0  }
   0xe   : > { %vm2151_vm3 = vcmask 1031168   ;;  %vm3114_vm4 = vcmask 900096   ;;  %vm4077_vm5 = vcmask 891904   ;;  %vm5040_vm6 = vcmask 883712   ;;  %s9365_s19 = smul.u32 6, %s10386_s9 }
   0xf   : > { %s177_s16 = scalar_lea.vmem %s10376_s0, %s9364_s13  ;;  %vm6003_vm7 = vcmask 752640   ;;  %vm6966_vm8 = vcmask 744448   ;;  %vm7929_vm9 = vcmask 736256   ;;  %vm191_vm10 = vcmask 1041408  }
  0x10   : > { %v9475_v0 = vld [vmem:[%s177_s16 + $0x8] sm:$0xff]  ;;  %v9477_v1 = vld [vmem:[%s177_s16] sm:$0xff]  ;;  %v9481_v2 = vld [vmem:[%s177_s16 + $0x10] sm:$0xff]  ;;  %vm192_vm11 = vcmask 1043458   ;;  %vm194_vm12 = vcmask 259076   ;;  %s10332_s22 = scalar_lea.vmem %s10378_s2, %s9365_s19 }
  0x11   : > { %240 = vrot.lane.b32.xlu0 %v9475_v0, %s9425_s17  ;;  %238 = vrot.lane.b32.xlu1 %v9477_v1, %s9425_s17  ;;  %v9543_v32 = vand.u32 4294901760, %v9475_v0  ;;  %v9550_v35 = vand.u32 4294901760, %v9477_v1  ;;  %v9589_v48 = vand.u32 4294901760, %v9481_v2  ;;  %vm193_vm13 = vmor %vm192_vm11, %vm191_vm10 }
  0x12   : > { %vm10334_vm14 = vmor %vm194_vm12, %vm193_vm13 }
  0x13   : > { %v9556_v37 = vsub.f32 %v9475_v0, %v9543_v32  ;;  %v9561_v40 = vsub.f32 %v9477_v1, %v9550_v35  ;;  %v9606_v54 = vsub.f32 %v9481_v2, %v9589_v48  ;;  %196 = vst.msk [vmem:[%s10332_s22] sm:$0x3f] %vm10334_vm14, %v9426_v6 }
  0x15   : > { %242 = vrot.lane.b32.xlu0 %v9481_v2, %s9425_s17  ;;  %v1310_v42 = vand.u32 4294901760, %v9556_v37  ;;  %v1316_v44 = vand.u32 4294901760, %v9561_v40  ;;  %v1774_v57 = vand.u32 4294901760, %v9606_v54 }
  0x17   : > { %v1311_v46 = vsub.f32 %v9556_v37, %v1310_v42  ;;  %v1317_v47 = vsub.f32 %v9561_v40, %v1316_v44  ;;  %v1775_v62 = vsub.f32 %v9606_v54, %v1774_v57 }
  0x19   : > { %v1312_v50 = vand.u32 4294901760, %v1311_v46  ;;  %v1318_v53 = vand.u32 4294901760, %v1317_v47 }
  0x33   : > { %1165 = vxpose.xlu0.b32.start.end [1/1] (short) (narrow) %v200_v3, 8 }
  0x37   : > { %3076 = vxpose.xlu0.b32.start.end [1/1] (short) (narrow) %v8978_v4, 8 }
  0x3a   : > { %203 = vxpose.xlu1.b32.start.end [1/1] (short) (narrow) %v8976_v5, 8  ;;  %v8981_v5 = vld [vmem:[%s10377_s1 + $0x30] sm:$0xff] }
  0x3e   : > { %2113 = vxpose.xlu1.b32.start.end [1/1] (short) (narrow) %v8977_v7, 8 }
  0x5c   : > { %2145 = vrot.lane.b32.xlu1 %v9477_v1, %s9427_s26 }
  0x60   : > { %2147 = vrot.lane.b32.xlu0 %v9475_v0, %s9427_s26  ;;  %3112 = vrot.lane.b32.xlu1 %v9481_v2, %s9428_s27 }
  0x64   : > { %2149 = vrot.lane.b32.xlu0 %v9481_v2, %s9427_s26  ;;  %4071 = vrot.lane.b32.xlu1 %v9477_v1, %s9429_s28 }
  0x68   : > { %3110 = vrot.lane.b32.xlu0 %v9475_v0, %s9428_s27 }
  0x6c   : > { %3108 = vrot.lane.b32.xlu0 %v9477_v1, %s9428_s27 }
  0x70   : > { %4073 = vrot.lane.b32.xlu0 %v9475_v0, %s9429_s28 }
  0x74   : > { %4075 = vrot.lane.b32.xlu0 %v9481_v2, %s9429_s28 }
  0x78   : > { %5036 = vrot.lane.b32.xlu0 %v9475_v0, %s9430_s29 }
  0x7c   : > { %5034 = vrot.lane.b32.xlu0 %v9477_v1, %s9430_s29 }
  0x80   : > { %5999 = vrot.lane.b32.xlu0 %v9475_v0, %s9431_s30 }
  0x83   : > { %v241_v8 = vpop.permute.xlu0 %240  ;;  %v239_v9 = vpop.permute.xlu1 %238 }
  0x84   : > { %v245_v10 = vsel %vm244_vm0, %v239_v9, %v241_v8  ;;  %6001 = vrot.lane.b32.xlu0 %v9481_v2, %s9431_s30 }
  0x85   : > { %v286_v11 = vand.u32 4294901760, %v245_v10 }
  0x87   : > { %v9515_v12 = vsub.f32 %v245_v10, %v286_v11  ;;  %v243_v13 = vpop.permute.xlu0 %242 }
  0x88   : > { %v246_v14 = vsel %vm244_vm0, %v241_v8, %v243_v13  ;;  %v750_v25 = vand.u32 4294901760, %v243_v13  ;;  %v1776_v8 = vand.u32 4294901760, %v1775_v62 }
  0x89   : > { %v284_v15 = vand.u32 4294901760, %v246_v14  ;;  %v370_v17 = vand.u32 4294901760, %v9515_v12 }
  0x8a   : > { %v9531_v26 = vsub.f32 %v243_v13, %v750_v25 }
  0x8b   : > { %285 = vmatprep.subr.mxu0 %v284_v15  ;;  %v363_v18 = vsub.f32 %v246_v14, %v284_v15  ;;  %v371_v20 = vsub.f32 %v9515_v12, %v370_v17 }
  0x8c   : > { %287 = vmatpush1.msra.mxu0 %v286_v11  ;;  %v828_v30 = vand.u32 4294901760, %v9531_v26 }
  0x8d   : > { %4039 = vxpose.xlu1.b32.start.end [1/1] (short) (narrow) %v8979_v16, 8  ;;  %446 = vmatprep.subr.mxu0 %v363_v18  ;;  %v364_v19 = vand.u32 4294901760, %v363_v18  ;;  %v372_v23 = vand.u32 4294901760, %v371_v20 }
  0x8e   : > { %v829_v34 = vsub.f32 %v9531_v26, %v828_v30 }
  0x8f   : > { %v365_v21 = vsub.f32 %v363_v18, %v364_v19 }
  0x90   : > { %v830_v39 = vand.u32 4294901760, %v829_v34  ;;  %v8982_v34 = vld [vmem:[%s10377_s1 + $0x38] sm:$0xff] }
  0x91   : > { %v366_v22 = vand.u32 4294901760, %v365_v21 }
  0x93   : > { %367 = vmatprep.subr.mxu1 %v366_v22 }
  0x94   : > { %373 = vmatpush1.msra.mxu1 %v372_v23 }
  0x95   : > { %522 = vmatprep.subr.mxu1 %v284_v15 }
  0xa2   : > { %5002 = vxpose.xlu0.b32.start.end [1/1] (short) (narrow) %v8980_v24, 8 }
  0xab   : > { %5038 = vrot.lane.b32.xlu1 %v9481_v2, %s9430_s29 }
  0xaf   : > { %5997 = vrot.lane.b32.xlu1 %v9477_v1, %s9431_s30  ;;  %v1181_v41 = vpop.trf.xlu0 }
  0xb0   : > { %v1198_v43 = vsel %vm250_vm1, %v1181_v41, 0 }
  0xb1   : > { %v9574_v45 = vand.u32 4294901760, %v1198_v43 }
  0xb3   : > { %6964 = vrot.lane.b32.xlu1 %v9481_v2, %s9432_s7  ;;  %v9592_v49 = vsub.f32 %v1198_v43, %v9574_v45  ;;  %v9598_v51 = vpop.trf.xlu0 }
  0xb5   : > { %v9610_v55 = vand.u32 4294901760, %v9592_v49 }
  0xb6   : > { %v219_v27 = vpop.trf.xlu1 }
  0xb7   : > { %v252_v28 = vsel %vm250_vm1, %v219_v27, 0  ;;  %v1270_v59 = vsub.f32 %v9592_v49, %v9610_v55 }
  0xb8   : > { %v9534_v29 = vand.u32 4294901760, %v252_v28 }
  0xb9   : > { %v1271_v3 = vand.u32 4294901760, %v1270_v59 }
  0xba   : > { %v9538_v31 = vsub.f32 %v252_v28, %v9534_v29  ;;  %408 = vmatmul.mubr.f32.vlgmr.msra.gmra.mxu1 %v9534_v29  ;;  %v2129_v52 = vpop.trf.xlu1 }
  0xbb   : > { %524 = vmatpush1.msra.mxu1 %v286_v11  ;;  %557 = vmatprep.mubr.f32.mxu1 %v9426_v6  ;;  %v2158_v10 = vsel %vm250_vm1, %v2129_v52, 0 }
  0xbc   : > { %676 = vmatprep.subr.mxu1 %v284_v15  ;;  %v323_v33 = vand.u32 4294901760, %v9538_v31  ;;  %v9674_v13 = vand.u32 4294901760, %v2158_v10 }
  0xbe   : > { %561 = vmatmul.mubr.f32.vlgmr.msra.gmra.mxu1 %v323_v33  ;;  %v324_v36 = vsub.f32 %v9538_v31, %v323_v33  ;;  %v9691_v16 = vsub.f32 %v2158_v10, %v9674_v13 }
  0xbf   : > { %678 = vmatpush1.msra.mxu1 %v286_v11  ;;  %711 = vmatprep.mubr.f32.mxu1 %v9426_v6 }
  0xc0   : > { %9099 = vmatprep.subr.mxu1 %v9426_v6  ;;  %v325_v38 = vand.u32 4294901760, %v324_v36  ;;  %v9709_v21 = vand.u32 4294901760, %v9691_v16 }
  0xc2   : > { %326 = vmatmul.mubr.f32.vlgmr.msra.gmra.mxu0 %v325_v38  ;;  %713 = vmatmul.mubr.f32.vlgmr.msra.gmra.mxu1 %v9534_v29 }
  0xc3   : > { %449 = vmatpush1.msra.mxu0 %v9515_v12  ;;  %9100 = vmatpush3.msra.mxu1 %v830_v39 }
  0xc4   : > { %600 = vmatprep.subr.mxu0 %v364_v19  ;;  %482 = vmatprep.mubr.f32.mxu0 %v9426_v6 }
  0xc5   : > { %9101 = vmatprep.mubr.msk.f32.mxu1 %vm9433_vm2, %v9426_v6  ;;  %9109 = vmatprep.subr.mxu1 %v9426_v6 }
  0xc6   : > { %485 = vmatmul.mubr.f32.vlgmr.msra.gmra.mxu0 %v9538_v31  ;;  %9102 = vmatmul.mubr.f32.vlgmr.msra.gmra.mxu1 %v9534_v29 }
  0xc7   : > { %604 = vmatpush1.msra.mxu0 %v370_v17  ;;  %9110 = vmatpush3.msra.mxu1 %v750_v25 }
  0xc8   : > { %637 = vmatprep.mubr.f32.mxu0 %v9426_v6  ;;  %9094 = vmatprep.subr.mxu0 %v9426_v6 }
  0xc9   : > { %9111 = vmatprep.mubr.msk.f32.mxu1 %vm9433_vm2, %v9426_v6  ;;  %9119 = vmatprep.subr.mxu1 %v9426_v6 }
  0xca   : > { %639 = vmatmul.mubr.f32.vlgmr.msra.gmra.mxu0 %v9534_v29  ;;  %9112 = vmatmul.mubr.f32.vlgmr.msra.gmra.mxu1 %v323_v33 }
  0xcb   : > { %9095 = vmatpush3.msra.mxu0 %v750_v25  ;;  %9120 = vmatpush3.msra.mxu1 %v750_v25 }
  0xcc   : > { %6962 = vrot.lane.b32.xlu0 %v9475_v0, %s9432_s7  ;;  %9096 = vmatprep.mubr.msk.f32.mxu0 %vm9433_vm2, %v9426_v6 }
  0xcd   : > { %9104 = vmatprep.subr.mxu0 %v9426_v6  ;;  %9121 = vmatprep.mubr.msk.f32.mxu1 %vm9433_vm2, %v9426_v6 }
  0xce   : > { %9097 = vmatmul.mubr.f32.vlgmr.msra.gmra.mxu0 %v325_v38  ;;  %9122 = vmatmul.mubr.f32.vlgmr.msra.gmra.mxu1 %v9534_v29  ;;  %v2146_v58 = vpop.permute.xlu1 %2145 }
  0xcf   : > { %9105 = vmatpush3.msra.mxu0 %v9531_v26  ;;  %1313 = vmatprep.subr.mxu1 %v1312_v50  ;;  %v2230_v26 = vsub.f32 %v9691_v16, %v9709_v21 }
  0xd0   : > { %6960 = vrot.lane.b32.xlu0 %v9477_v1, %s9432_s7  ;;  %9106 = vmatprep.mubr.msk.f32.mxu0 %vm9433_vm2, %v9426_v6 }
  0xd1   : > { %9114 = vmatprep.subr.mxu0 %v9426_v6  ;;  %1319 = vmatpush1.msra.mxu1 %v1318_v53 }
  0xd2   : > { %1352 = vmatprep.mubr.f32.mxu1 %v9426_v6  ;;  %v2148_v56 = vpop.permute.xlu0 %2147  ;;  %9107 = vmatmul.mubr.f32.vlgmr.msra.gmra.mxu0 %v9538_v31  ;;  %v9712_v22 = vpop.permute.xlu1 %3112 }
  0xd3   : > { %9115 = vmatpush3.msra.mxu0 %v828_v30  ;;  %1354 = vmatmul.mubr.f32.vlgmr.msra.gmra.mxu1 %v9574_v45  ;;  %v2152_v60 = vsel %vm2151_vm3, %v2146_v58, %v2148_v56 }
  0xd4   : > { %7925 = vrot.lane.b32.xlu0 %v9475_v0, %s9434_s8  ;;  %1468 = vmatprep.subr.mxu1 %v9543_v32  ;;  %v9637_v63 = vand.u32 4294901760, %v2152_v60 }
  0xd5   : > { %9116 = vmatprep.mubr.msk.f32.mxu0 %vm9433_vm2, %v9426_v6  ;;  %1470 = vmatpush1.msra.mxu1 %v9550_v35 }
  0xd6   : > { %1503 = vmatprep.mubr.f32.mxu1 %v9426_v6  ;;  %v2150_v61 = vpop.permute.xlu0 %2149  ;;  %9117 = vmatmul.mubr.f32.vlgmr.msra.gmra.mxu0 %v9534_v29  ;;  %v2231_v29 = vand.u32 4294901760, %v2230_v26 }
  0xd7   : > { %v2153_v0 = vsel %vm2151_vm3, %v2148_v56, %v2150_v61  ;;  %1507 = vmatmul.mubr.f32.vlgmr.msra.gmra.mxu1 %v9610_v55  ;;  %1231 = vmatprep.subr.mxu0 %v9543_v32  ;;  %v9693_v17 = vand.u32 4294901760, %v2150_v61  ;;  %v8983_v56 = vld [vmem:[%s10377_s1 + $0x40] sm:$0xff] }
  0xd8   : > { %v9642_v4 = vand.u32 4294901760, %v2153_v0  ;;  %7927 = vrot.lane.b32.xlu0 %v9481_v2, %s9434_s8  ;;  %1622 = vmatprep.subr.mxu1 %v9543_v32  ;;  %v9658_v2 = vsub.f32 %v2152_v60, %v9637_v63 }
  0xd9   : > { %1233 = vmatpush1.msra.mxu0 %v9550_v35  ;;  %1266 = vmatprep.mubr.f32.mxu0 %v9426_v6  ;;  %v9705_v20 = vsub.f32 %v2150_v61, %v9693_v17 }
  0xda   : > { %v9653_v7 = vsub.f32 %v2153_v0, %v9642_v4  ;;  %1624 = vmatpush1.msra.mxu1 %v9550_v35  ;;  %1657 = vmatprep.mubr.f32.mxu1 %v9426_v6  ;;  %v2276_v12 = vand.u32 4294901760, %v9658_v2  ;;  %v3111_v18 = vpop.permute.xlu0 %3110 }
  0xdb   : > { %1272 = vmatmul.mubr.f32.vlgmr.msra.gmra.mxu0 %v1271_v3  ;;  %1659 = vmatmul.mubr.f32.vlgmr.msra.gmra.mxu1 %v9574_v45  ;;  %v3116_v23 = vsel %vm3114_vm4, %v3111_v18, %v9712_v22  ;;  %v2734_v25 = vand.u32 4294901760, %v9705_v20 }
  0xdc   : > { %5965 = vxpose.xlu1.b32.start.end [1/1] (short) (narrow) %v8981_v5, 8  ;;  %1392 = vmatprep.subr.mxu0 %v9556_v37  ;;  %v2270_v9 = vand.u32 4294901760, %v9653_v7  ;;  %v2277_v15 = vsub.f32 %v9658_v2, %v2276_v12  ;;  %v9729_v27 = vand.u32 4294901760, %v3116_v23  ;;  %v3121_v37 = vsel %vm250_vm1, %v9598_v51, 0  ;;  %v4072_v51 = vpop.permute.xlu1 %4071 }
  0xdd   : > { %9129 = vmatprep.subr.mxu1 %v9426_v6  ;;  %1395 = vmatpush1.msra.mxu0 %v9561_v40  ;;  %v2735_v30 = vsub.f32 %v9705_v20, %v2734_v25  ;;  %v9782_v41 = vand.u32 4294901760, %v3121_v37 }
  0xde   : > { %1428 = vmatprep.mubr.f32.mxu0 %v9426_v6  ;;  %9130 = vmatpush3.msra.mxu1 %v1776_v8  ;;  %v2271_v11 = vsub.f32 %v9653_v7, %v2270_v9  ;;  %v2278_v19 = vand.u32 4294901760, %v2277_v15  ;;  %v3109_v24 = vpop.permute.xlu0 %3108  ;;  %v9747_v32 = vsub.f32 %v3116_v23, %v9729_v27 }
  0xdf   : > { %9131 = vmatprep.mubr.msk.f32.mxu1 %vm9433_vm2, %v9426_v6  ;;  %1431 = vmatmul.mubr.f32.vlgmr.msra.gmra.mxu0 %v9592_v49  ;;  %v3115_v28 = vsel %vm3114_vm4, %v3109_v24, %v3111_v18  ;;  %v2736_v33 = vand.u32 4294901760, %v2735_v30 }
  0xe0   : > { %9132 = vmatmul.mubr.f32.vlgmr.msra.gmra.mxu1 %v9574_v45  ;;  %9139 = vmatprep.subr.mxu1 %v9426_v6  ;;  %v2272_v14 = vand.u32 4294901760, %v2271_v11  ;;  %v9742_v31 = vand.u32 4294901760, %v3115_v28  ;;  %v3233_v36 = vand.u32 4294901760, %v9747_v32 }
  0xe1   : > { %1546 = vmatprep.subr.mxu0 %v1310_v42  ;;  %9140 = vmatpush3.msra.mxu1 %v9589_v48  ;;  %v9788_v42 = vand.u32 4294901760, %v9712_v22 }
  0xe2   : > { %1550 = vmatpush1.msra.mxu0 %v1316_v44  ;;  %1583 = vmatprep.mubr.f32.mxu0 %v9426_v6  ;;  %v9758_v35 = vsub.f32 %v3115_v28, %v9742_v31  ;;  %v4074_v39 = vpop.permute.xlu0 %4073  ;;  %v3234_v40 = vsub.f32 %v9747_v32, %v3233_v36 }
  0xe3   : > { %9141 = vmatprep.mubr.msk.f32.mxu1 %vm9433_vm2, %v9426_v6  ;;  %9149 = vmatprep.subr.mxu1 %v9426_v6  ;;  %v4078_v52 = vsel %vm4077_vm5, %v4072_v51, %v4074_v39 }
  0xe4   : > { %1585 = vmatmul.mubr.f32.vlgmr.msra.gmra.mxu0 %v9574_v45  ;;  %9142 = vmatmul.mubr.f32.vlgmr.msra.gmra.mxu1 %v9610_v55  ;;  %v3239_v38 = vand.u32 4294901760, %v9758_v35  ;;  %v3235_v44 = vand.u32 4294901760, %v3234_v40  ;;  %v9835_v55 = vand.u32 4294901760, %v4078_v52 }
  0xe5   : > { %9150 = vmatpush3.msra.mxu1 %v9589_v48  ;;  %9124 = vmatprep.subr.mxu0 %v9426_v6 }
  0xe6   : > { %2273 = vmatprep.subr.mxu1 %v2272_v14  ;;  %9125 = vmatpush3.msra.mxu0 %v9589_v48  ;;  %v3240_v43 = vsub.f32 %v9758_v35, %v3239_v38  ;;  %v9804_v46 = vpop.permute.xlu0 %4075  ;;  %v9853_v61 = vsub.f32 %v4078_v52, %v9835_v55 }
  0xe7   : > { %9126 = vmatprep.mubr.msk.f32.mxu0 %vm9433_vm2, %v9426_v6  ;;  %9151 = vmatprep.mubr.msk.f32.mxu1 %vm9433_vm2, %v9426_v6  ;;  %v4079_v48 = vsel %vm4077_vm5, %v4074_v39, %v9804_v46 }
  0xe8   : > { %9127 = vmatmul.mubr.f32.vlgmr.msra.gmra.mxu0 %v1271_v3  ;;  %9152 = vmatmul.mubr.f32.vlgmr.msra.gmra.mxu1 %v9574_v45  ;;  %v3241_v47 = vand.u32 4294901760, %v3240_v43  ;;  %v9824_v53 = vand.u32 4294901760, %v4079_v48 }
  0xe9   : > { %2279 = vmatpush1.msra.mxu1 %v2278_v19  ;;  %9134 = vmatprep.subr.mxu0 %v9426_v6 }
  0xea   : > { %2428 = vmatprep.subr.mxu1 %v9642_v4  ;;  %9135 = vmatpush3.msra.mxu0 %v9606_v54  ;;  %v9846_v58 = vsub.f32 %v4079_v48, %v9824_v53 }
  0xeb   : > { %9136 = vmatprep.mubr.msk.f32.mxu0 %vm9433_vm2, %v9426_v6  ;;  %9144 = vmatprep.subr.mxu0 %v9426_v6 }
  0xec   : > { %2312 = vmatprep.mubr.f32.mxu1 %v9426_v6  ;;  %9137 = vmatmul.mubr.f32.vlgmr.msra.gmra.mxu0 %v9592_v49  ;;  %v4196_v0 = vand.u32 4294901760, %v9846_v58 }
  0xed   : > { %9145 = vmatpush3.msra.mxu0 %v1774_v57  ;;  %2314 = vmatmul.mubr.f32.vlgmr.msra.gmra.mxu1 %v9674_v13 }
  0xee   : > { %2430 = vmatpush1.msra.mxu1 %v9637_v63  ;;  %2191 = vmatprep.subr.mxu0 %v9642_v4  ;;  %v4197_v5 = vsub.f32 %v9846_v58, %v4196_v0 }
  0xef   : > { %2582 = vmatprep.subr.mxu1 %v9642_v4  ;;  %9146 = vmatprep.mubr.msk.f32.mxu0 %vm9433_vm2, %v9426_v6  ;;  %v4202_v4 = vand.u32 4294901760, %v9853_v61 }
  0xf0   : > { %2463 = vmatprep.mubr.f32.mxu1 %v9426_v6  ;;  %9147 = vmatmul.mubr.f32.vlgmr.msra.gmra.mxu0 %v9574_v45  ;;  %v9802_v45 = vsub.f32 %v3121_v37, %v9782_v41  ;;  %v4198_v10 = vand.u32 4294901760, %v4197_v5 }
  0xf1   : > { %2193 = vmatpush1.msra.mxu0 %v9637_v63  ;;  %2467 = vmatmul.mubr.f32.vlgmr.msra.gmra.mxu1 %v9709_v21 }
  0xf2   : > { %2584 = vmatpush1.msra.mxu1 %v9637_v63  ;;  %2352 = vmatprep.subr.mxu0 %v9653_v7  ;;  %v3192_v49 = vand.u32 4294901760, %v9802_v45  ;;  %v5037_v63 = vpop.permute.xlu0 %5036 }
  0xf3   : > { %2226 = vmatprep.mubr.f32.mxu0 %v9426_v6  ;;  %2617 = vmatprep.mubr.f32.mxu1 %v9426_v6 }
  0xf4   : > { %9159 = vmatprep.subr.mxu1 %v9426_v6  ;;  %2232 = vmatmul.mubr.f32.vlgmr.msra.gmra.mxu0 %v2231_v29  ;;  %v3193_v54 = vsub.f32 %v9802_v45, %v3192_v49 }
  0xf5   : > { %2355 = vmatpush1.msra.mxu0 %v9658_v2  ;;  %2619 = vmatmul.mubr.f32.vlgmr.msra.gmra.mxu1 %v9674_v13  ;;  %v4203_v2 = vsub.f32 %v9853_v61, %v4202_v4 }
  0xf6   : > { %9160 = vmatpush3.msra.mxu1 %v2736_v33  ;;  %2506 = vmatprep.subr.mxu0 %v2270_v9  ;;  %v3194_v59 = vand.u32 4294901760, %v3193_v54  ;;  %v5035_v8 = vpop.permute.xlu0 %5034  ;;  %v9884_v9 = vand.u32 4294901760, %v9804_v46 }
  0xf7   : > { %6928 = vxpose.xlu0.b32.start.end [1/1] (short) (narrow) %v8982_v34, 8  ;;  %2388 = vmatprep.mubr.f32.mxu0 %v9426_v6  ;;  %v5041_v18 = vsel %vm5040_vm6, %v5035_v8, %v5037_v63 }
  0xf8   : > { %9161 = vmatprep.mubr.msk.f32.mxu1 %vm9433_vm2, %v9426_v6  ;;  %9169 = vmatprep.subr.mxu1 %v9426_v6  ;;  %v9927_v23 = vand.u32 4294901760, %v5041_v18 }
  0xf9   : > { %2391 = vmatmul.mubr.f32.vlgmr.msra.gmra.mxu0 %v9691_v16  ;;  %9162 = vmatmul.mubr.f32.vlgmr.msra.gmra.mxu1 %v9674_v13 }
  0xfa   : > { %2510 = vmatpush1.msra.mxu0 %v2276_v12  ;;  %9170 = vmatpush3.msra.mxu1 %v9693_v17  ;;  %v9899_v12 = vsub.f32 %v9804_v46, %v9884_v9  ;;  %v9904_v14 = vpop.permute.xlu0 %5999  ;;  %v9944_v28 = vsub.f32 %v5041_v18, %v9927_v23 }
  0xfb   : > { %2543 = vmatprep.mubr.f32.mxu0 %v9426_v6  ;;  %9154 = vmatprep.subr.mxu0 %v9426_v6 }
  0xfc   : > { %9171 = vmatprep.mubr.msk.f32.mxu1 %vm9433_vm2, %v9426_v6  ;;  %9179 = vmatprep.subr.mxu1 %v9426_v6 }
  0xfd   : > { %7923 = vrot.lane.b32.xlu1 %v9477_v1, %s9434_s8  ;;  %2545 = vmatmul.mubr.f32.vlgmr.msra.gmra.mxu0 %v9674_v13  ;;  %v9809_v1 = vsub.f32 %v9712_v22, %v9788_v42 }
  0xfe   : > { %9155 = vmatpush3.msra.mxu0 %v9693_v17  ;;  %9172 = vmatmul.mubr.f32.vlgmr.msra.gmra.mxu1 %v9709_v21  ;;  %v9923_v22 = vpop.permute.xlu0 %6001 }
  0xff   : > { %9180 = vmatpush3.msra.mxu1 %v9693_v17  ;;  %9156 = vmatprep.mubr.msk.f32.mxu0 %vm9433_vm2, %v9426_v6  ;;  %v3697_v50 = vand.u32 4294901760, %v9809_v1 }
 0x100   : > { %3236 = vmatprep.subr.mxu1 %v3235_v44  ;;  %9164 = vmatprep.subr.mxu0 %v9426_v6 }
 0x101   : > { %9181 = vmatprep.mubr.msk.f32.mxu1 %vm9433_vm2, %v9426_v6  ;;  %9157 = vmatmul.mubr.f32.vlgmr.msra.gmra.mxu0 %v2231_v29  ;;  %v3698_v57 = vsub.f32 %v9809_v1, %v3697_v50 }
 0x102   : > { %9165 = vmatpush3.msra.mxu0 %v9705_v20  ;;  %9182 = vmatmul.mubr.f32.vlgmr.msra.gmra.mxu1 %v9674_v13 }
 0x103   : > { %3242 = vmatpush1.msra.mxu1 %v3241_v47  ;;  %9166 = vmatprep.mubr.msk.f32.mxu0 %vm9433_vm2, %v9426_v6  ;;  %v3699_v62 = vand.u32 4294901760, %v3698_v57 }
 0x104   : > { %3391 = vmatprep.subr.mxu1 %v9729_v27  ;;  %9174 = vmatprep.subr.mxu0 %v9426_v6 }
 0x105   : > { %3275 = vmatprep.mubr.f32.mxu1 %v9426_v6  ;;  %9167 = vmatmul.mubr.f32.vlgmr.msra.gmra.mxu0 %v9691_v16  ;;  %v4660_v16 = vand.u32 4294901760, %v9899_v12 }
 0x106   : > { %9175 = vmatpush3.msra.mxu0 %v2734_v25  ;;  %3277 = vmatmul.mubr.f32.vlgmr.msra.gmra.mxu1 %v9782_v41 }
 0x107   : > { %3393 = vmatpush1.msra.mxu1 %v9742_v31  ;;  %3154 = vmatprep.subr.mxu0 %v9729_v27  ;;  %v4661_v24 = vsub.f32 %v9899_v12, %v4660_v16 }
 0x108   : > { %3545 = vmatprep.subr.mxu1 %v9729_v27  ;;  %9176 = vmatprep.mubr.msk.f32.mxu0 %vm9433_vm2, %v9426_v6 }
 0x109   : > { %3426 = vmatprep.mubr.f32.mxu1 %v9426_v6  ;;  %9177 = vmatmul.mubr.f32.vlgmr.msra.gmra.mxu0 %v9674_v13  ;;  %v4055_v60 = vpop.trf.xlu1  ;;  %v4204_v13 = vand.u32 4294901760, %v4203_v2  ;;  %v4662_v29 = vand.u32 4294901760, %v4661_v24 }
 0x10a   : > { %3156 = vmatpush1.msra.mxu0 %v9742_v31  ;;  %3430 = vmatmul.mubr.f32.vlgmr.msra.gmra.mxu1 %v3192_v49  ;;  %v4084_v3 = vsel %vm250_vm1, %v4055_v60, 0 }
 0x10b   : > { %3547 = vmatpush1.msra.mxu1 %v9742_v31  ;;  %3315 = vmatprep.subr.mxu0 %v9747_v32  ;;  %v9873_v7 = vand.u32 4294901760, %v4084_v3  ;;  %v5165_v32 = vand.u32 4294901760, %v9944_v28 }
 0x10c   : > { %7891 = vxpose.xlu0.b32.start.end [1/1] (short) (narrow) %v8983_v56, 8  ;;  %3189 = vmatprep.mubr.f32.mxu0 %v9426_v6 }
 0x10d   : > { %3580 = vmatprep.mubr.f32.mxu1 %v9426_v6  ;;  %9189 = vmatprep.subr.mxu1 %v9426_v6  ;;  %v9891_v11 = vsub.f32 %v4084_v3, %v9873_v7 }
 0x10e   : > { %3195 = vmatmul.mubr.f32.vlgmr.msra.gmra.mxu0 %v3194_v59  ;;  %3582 = vmatmul.mubr.f32.vlgmr.msra.gmra.mxu1 %v9782_v41 }
 0x10f   : > { %3318 = vmatpush1.msra.mxu0 %v9758_v35  ;;  %9190 = vmatpush3.msra.mxu1 %v3699_v62  ;;  %v4155_v15 = vand.u32 4294901760, %v9891_v11  ;;  %v5166_v35 = vsub.f32 %v9944_v28, %v5165_v32 }
 0x110   : > { %3469 = vmatprep.subr.mxu0 %v3233_v36  ;;  %3351 = vmatprep.mubr.f32.mxu0 %v9426_v6 }
 0x111   : > { %9191 = vmatprep.mubr.msk.f32.mxu1 %vm9433_vm2, %v9426_v6  ;;  %9199 = vmatprep.subr.mxu1 %v9426_v6  ;;  %v4156_v20 = vsub.f32 %v9891_v11, %v4155_v15  ;;  %v5167_v40 = vand.u32 4294901760, %v5166_v35 }
 0x112   : > { %3354 = vmatmul.mubr.f32.vlgmr.msra.gmra.mxu0 %v9802_v45  ;;  %9192 = vmatmul.mubr.f32.vlgmr.msra.gmra.mxu1 %v9782_v41 }
 0x113   : > { %3473 = vmatpush1.msra.mxu0 %v3239_v38  ;;  %9200 = vmatpush3.msra.mxu1 %v9788_v42  ;;  %v4157_v26 = vand.u32 4294901760, %v4156_v20 }
 0x114   : > { %3506 = vmatprep.mubr.f32.mxu0 %v9426_v6  ;;  %9184 = vmatprep.subr.mxu0 %v9426_v6 }
 0x115   : > { %9201 = vmatprep.mubr.msk.f32.mxu1 %vm9433_vm2, %v9426_v6  ;;  %9209 = vmatprep.subr.mxu1 %v9426_v6 }
 0x116   : > { %3508 = vmatmul.mubr.f32.vlgmr.msra.gmra.mxu0 %v9782_v41  ;;  %9202 = vmatmul.mubr.f32.vlgmr.msra.gmra.mxu1 %v3192_v49 }
 0x117   : > { %9185 = vmatpush3.msra.mxu0 %v9788_v42  ;;  %9210 = vmatpush3.msra.mxu1 %v9788_v42  ;;  %v6005_v42 = vsel %vm6003_vm7, %v9904_v14, %v9923_v22 }
 0x118   : > { %4199 = vmatprep.subr.mxu1 %v4198_v10  ;;  %9186 = vmatprep.mubr.msk.f32.mxu0 %vm9433_vm2, %v9426_v6 }
 0x119   : > { %9194 = vmatprep.subr.mxu0 %v9426_v6  ;;  %9211 = vmatprep.mubr.msk.f32.mxu1 %vm9433_vm2, %v9426_v6 }
 0x11a   : > { %9187 = vmatmul.mubr.f32.vlgmr.msra.gmra.mxu0 %v3194_v59  ;;  %9212 = vmatmul.mubr.f32.vlgmr.msra.gmra.mxu1 %v9782_v41  ;;  %v6508_v59 = vand.u32 4294901760, %v9923_v22 }
 0x11b   : > { %9195 = vmatpush3.msra.mxu0 %v9809_v1  ;;  %4205 = vmatpush1.msra.mxu1 %v4204_v13 }
 0x11c   : > { %4354 = vmatprep.subr.mxu1 %v9824_v53  ;;  %9196 = vmatprep.mubr.msk.f32.mxu0 %vm9433_vm2, %v9426_v6  ;;  %v10093_v62 = vsub.f32 %v9923_v22, %v6508_v59 }
 0x11d   : > { %9204 = vmatprep.subr.mxu0 %v9426_v6  ;;  %4238 = vmatprep.mubr.f32.mxu1 %v9426_v6  ;;  %v5039_v17 = vpop.permute.xlu1 %5038 }
 0x11e   : > { %9197 = vmatmul.mubr.f32.vlgmr.msra.gmra.mxu0 %v9802_v45  ;;  %4240 = vmatmul.mubr.f32.vlgmr.msra.gmra.mxu1 %v9873_v7  ;;  %v5042_v19 = vsel %vm5040_vm6, %v5037_v63, %v5039_v17  ;;  %v5018_v27 = vpop.trf.xlu0  ;;  %v9974_v36 = vand.u32 4294901760, %v5039_v17  ;;  %v10005_v45 = vand.u32 4294901760, %v6005_v42 }
 0x11f   : > { %9205 = vmatpush3.msra.mxu0 %v3697_v50  ;;  %4356 = vmatpush1.msra.mxu1 %v9835_v55  ;;  %v9921_v21 = vand.u32 4294901760, %v5042_v19  ;;  %v5047_v31 = vsel %vm250_vm1, %v5018_v27, 0 }
 0x120   : > { %4117 = vmatprep.subr.mxu0 %v9824_v53  ;;  %4508 = vmatprep.subr.mxu1 %v9824_v53  ;;  %v9964_v34 = vand.u32 4294901760, %v5047_v31  ;;  %v9988_v39 = vsub.f32 %v5039_v17, %v9974_v36  ;;  %v10026_v49 = vsub.f32 %v6005_v42, %v10005_v45 }
 0x121   : > { %9206 = vmatprep.mubr.msk.f32.mxu0 %vm9433_vm2, %v9426_v6  ;;  %4389 = vmatprep.mubr.f32.mxu1 %v9426_v6  ;;  %v9936_v25 = vsub.f32 %v5042_v19, %v9921_v21  ;;  %v5998_v43 = vpop.permute.xlu1 %5997 }
 0x122   : > { %9207 = vmatmul.mubr.f32.vlgmr.msra.gmra.mxu0 %v9782_v41  ;;  %4393 = vmatmul.mubr.f32.vlgmr.msra.gmra.mxu1 %v4155_v15  ;;  %v9981_v38 = vsub.f32 %v5047_v31, %v9964_v34  ;;  %v5623_v44 = vand.u32 4294901760, %v9988_v39  ;;  %v6004_v46 = vsel %vm6003_vm7, %v5998_v43, %v9904_v14  ;;  %v6122_v53 = vand.u32 4294901760, %v10026_v49 }
 0x123   : > { %4119 = vmatpush1.msra.mxu0 %v9835_v55  ;;  %4510 = vmatpush1.msra.mxu1 %v9835_v55  ;;  %v5159_v30 = vand.u32 4294901760, %v9936_v25  ;;  %v10017_v47 = vand.u32 4294901760, %v6004_v46 }
 0x124   : > { %4278 = vmatprep.subr.mxu0 %v9846_v58  ;;  %4152 = vmatprep.mubr.f32.mxu0 %v9426_v6  ;;  %v5118_v41 = vand.u32 4294901760, %v9981_v38  ;;  %v5624_v48 = vsub.f32 %v9988_v39, %v5623_v44  ;;  %v6123_v55 = vsub.f32 %v10026_v49, %v6122_v53 }
 0x125   : > { %4543 = vmatprep.mubr.f32.mxu1 %v9426_v6  ;;  %9219 = vmatprep.subr.mxu1 %v9426_v6  ;;  %v5160_v33 = vsub.f32 %v9936_v25, %v5159_v30  ;;  %v10034_v51 = vsub.f32 %v6004_v46, %v10017_v47 }
 0x126   : > { %4158 = vmatmul.mubr.f32.vlgmr.msra.gmra.mxu0 %v4157_v26  ;;  %4545 = vmatmul.mubr.f32.vlgmr.msra.gmra.mxu1 %v9873_v7  ;;  %v5119_v1 = vsub.f32 %v9981_v38, %v5118_v41  ;;  %v5625_v52 = vand.u32 4294901760, %v5624_v48  ;;  %v6124_v57 = vand.u32 4294901760, %v6123_v55 }
 0x127   : > { %4281 = vmatpush1.msra.mxu0 %v9853_v61  ;;  %9220 = vmatpush3.msra.mxu1 %v4662_v29  ;;  %v5161_v37 = vand.u32 4294901760, %v5160_v33  ;;  %v6128_v54 = vand.u32 4294901760, %v10034_v51  ;;  %v10089_v61 = vpop.permute.xlu1 %6964 }
 0x128   : > { %4432 = vmatprep.subr.mxu0 %v4196_v0  ;;  %4314 = vmatprep.mubr.f32.mxu0 %v9426_v6  ;;  %v5120_v50 = vand.u32 4294901760, %v5119_v1  ;;  %v10152_v24 = vand.u32 4294901760, %v10089_v61 }
 0x129   : > { %9221 = vmatprep.mubr.msk.f32.mxu1 %vm9433_vm2, %v9426_v6  ;;  %9229 = vmatprep.subr.mxu1 %v9426_v6  ;;  %v6129_v56 = vsub.f32 %v10034_v51, %v6128_v54 }
 0x12a   : > { %4317 = vmatmul.mubr.f32.vlgmr.msra.gmra.mxu0 %v9891_v11  ;;  %9222 = vmatmul.mubr.f32.vlgmr.msra.gmra.mxu1 %v9873_v7  ;;  %v10165_v27 = vsub.f32 %v10089_v61, %v10152_v24 }
 0x12b   : > { %4436 = vmatpush1.msra.mxu0 %v4202_v4  ;;  %9230 = vmatpush3.msra.mxu1 %v9884_v9  ;;  %v6130_v58 = vand.u32 4294901760, %v6129_v56 }
 0x12c   : > { %4469 = vmatprep.mubr.f32.mxu0 %v9426_v6  ;;  %9214 = vmatprep.subr.mxu0 %v9426_v6  ;;  %v7549_v33 = vand.u32 4294901760, %v10165_v27 }
 0x12d   : > { %9231 = vmatprep.mubr.msk.f32.mxu1 %vm9433_vm2, %v9426_v6  ;;  %9239 = vmatprep.subr.mxu1 %v9426_v6 }
 0x12e   : > { %4471 = vmatmul.mubr.f32.vlgmr.msra.gmra.mxu0 %v9873_v7  ;;  %9232 = vmatmul.mubr.f32.vlgmr.msra.gmra.mxu1 %v4155_v15 }
 0x12f   : > { %9215 = vmatpush3.msra.mxu0 %v9884_v9  ;;  %9240 = vmatpush3.msra.mxu1 %v9884_v9 }
 0x130   : > { %5162 = vmatprep.subr.mxu1 %v5161_v37  ;;  %9216 = vmatprep.mubr.msk.f32.mxu0 %vm9433_vm2, %v9426_v6 }
 0x131   : > { %9224 = vmatprep.subr.mxu0 %v9426_v6  ;;  %9241 = vmatprep.mubr.msk.f32.mxu1 %vm9433_vm2, %v9426_v6 }
 0x132   : > { %9217 = vmatmul.mubr.f32.vlgmr.msra.gmra.mxu0 %v4157_v26  ;;  %9242 = vmatmul.mubr.f32.vlgmr.msra.gmra.mxu1 %v9873_v7 }
 0x133   : > { %9225 = vmatpush3.msra.mxu0 %v9899_v12  ;;  %5168 = vmatpush1.msra.mxu1 %v5167_v40  ;;  %v7550_v40 = vsub.f32 %v10165_v27, %v7549_v33 }
 0x134   : > { %5317 = vmatprep.subr.mxu1 %v9921_v21  ;;  %9226 = vmatprep.mubr.msk.f32.mxu0 %vm9433_vm2, %v9426_v6 }
 0x135   : > { %9234 = vmatprep.subr.mxu0 %v9426_v6  ;;  %5201 = vmatprep.mubr.f32.mxu1 %v9426_v6  ;;  %v7551_v46 = vand.u32 4294901760, %v7550_v40 }
 0x136   : > { %9227 = vmatmul.mubr.f32.vlgmr.msra.gmra.mxu0 %v9891_v11  ;;  %5203 = vmatmul.mubr.f32.vlgmr.msra.gmra.mxu1 %v9964_v34 }
 0x137   : > { %9235 = vmatpush3.msra.mxu0 %v4660_v16  ;;  %5319 = vmatpush1.msra.mxu1 %v9927_v23 }
 0x138   : > { %5080 = vmatprep.subr.mxu0 %v9921_v21  ;;  %5471 = vmatprep.subr.mxu1 %v9921_v21 }
 0x139   : > { %9236 = vmatprep.mubr.msk.f32.mxu0 %vm9433_vm2, %v9426_v6  ;;  %5352 = vmatprep.mubr.f32.mxu1 %v9426_v6 }
 0x13a   : > { %9237 = vmatmul.mubr.f32.vlgmr.msra.gmra.mxu0 %v9873_v7  ;;  %5356 = vmatmul.mubr.f32.vlgmr.msra.gmra.mxu1 %v5118_v41  ;;  %v6586_v7 = vand.u32 4294901760, %v10093_v62 }
 0x13b   : > { %5082 = vmatpush1.msra.mxu0 %v9927_v23  ;;  %5473 = vmatpush1.msra.mxu1 %v9927_v23 }
 0x13c   : > { %5241 = vmatprep.subr.mxu0 %v9936_v25  ;;  %5115 = vmatprep.mubr.f32.mxu0 %v9426_v6  ;;  %v6587_v12 = vsub.f32 %v10093_v62, %v6586_v7 }
 0x13d   : > { %5506 = vmatprep.mubr.f32.mxu1 %v9426_v6  ;;  %9249 = vmatprep.subr.mxu1 %v9426_v6 }
 0x13e   : > { %5121 = vmatmul.mubr.f32.vlgmr.msra.gmra.mxu0 %v5120_v50  ;;  %5508 = vmatmul.mubr.f32.vlgmr.msra.gmra.mxu1 %v9964_v34  ;;  %v6963_v60 = vpop.permute.xlu0 %6962  ;;  %v6588_v17 = vand.u32 4294901760, %v6587_v12 }
 0x13f   : > { %5244 = vmatpush1.msra.mxu0 %v9944_v28  ;;  %9250 = vmatpush3.msra.mxu1 %v5625_v52  ;;  %v6968_v0 = vsel %vm6966_vm8, %v6963_v60, %v10089_v61 }
 0x140   : > { %5395 = vmatprep.subr.mxu0 %v5159_v30  ;;  %5277 = vmatprep.mubr.f32.mxu0 %v9426_v6  ;;  %v10100_v8 = vand.u32 4294901760, %v6968_v0 }
 0x141   : > { %9251 = vmatprep.mubr.msk.f32.mxu1 %vm9433_vm2, %v9426_v6  ;;  %9259 = vmatprep.subr.mxu1 %v9426_v6 }
 0x142   : > { %5280 = vmatmul.mubr.f32.vlgmr.msra.gmra.mxu0 %v9981_v38  ;;  %9252 = vmatmul.mubr.f32.vlgmr.msra.gmra.mxu1 %v9964_v34  ;;  %v6961_v3 = vpop.permute.xlu0 %6960  ;;  %v10116_v13 = vsub.f32 %v6968_v0, %v10100_v8 }
 0x143   : > { %5399 = vmatpush1.msra.mxu0 %v5165_v32  ;;  %9260 = vmatpush3.msra.mxu1 %v9974_v36  ;;  %v6967_v2 = vsel %vm6966_vm8, %v6961_v3, %v6963_v60 }
 0x144   : > { %5432 = vmatprep.mubr.f32.mxu0 %v9426_v6  ;;  %9244 = vmatprep.subr.mxu0 %v9426_v6  ;;  %v10110_v11 = vand.u32 4294901760, %v6967_v2  ;;  %v7085_v18 = vand.u32 4294901760, %v10116_v13 }
 0x145   : > { %9261 = vmatprep.mubr.msk.f32.mxu1 %vm9433_vm2, %v9426_v6  ;;  %9269 = vmatprep.subr.mxu1 %v9426_v6 }
 0x146   : > { %5434 = vmatmul.mubr.f32.vlgmr.msra.gmra.mxu0 %v9964_v34  ;;  %9262 = vmatmul.mubr.f32.vlgmr.msra.gmra.mxu1 %v5118_v41  ;;  %v10123_v16 = vsub.f32 %v6967_v2, %v10110_v11  ;;  %v7086_v20 = vsub.f32 %v10116_v13, %v7085_v18  ;;  %v7926_v21 = vpop.permute.xlu0 %7925 }
 0x147   : > { %9245 = vmatpush3.msra.mxu0 %v9974_v36  ;;  %9270 = vmatpush3.msra.mxu1 %v9974_v36 }
 0x148   : > { %6125 = vmatprep.subr.mxu1 %v6124_v57  ;;  %9246 = vmatprep.mubr.msk.f32.mxu0 %vm9433_vm2, %v9426_v6  ;;  %v7091_v19 = vand.u32 4294901760, %v10123_v16  ;;  %v7087_v23 = vand.u32 4294901760, %v7086_v20 }
 0x149   : > { %9254 = vmatprep.subr.mxu0 %v9426_v6  ;;  %9271 = vmatprep.mubr.msk.f32.mxu1 %vm9433_vm2, %v9426_v6 }
 0x14a   : > { %9247 = vmatmul.mubr.f32.vlgmr.msra.gmra.mxu0 %v5120_v50  ;;  %9272 = vmatmul.mubr.f32.vlgmr.msra.gmra.mxu1 %v9964_v34  ;;  %v7092_v22 = vsub.f32 %v10123_v16, %v7091_v19  ;;  %v10156_v25 = vpop.permute.xlu0 %7927 }
 0x14b   : > { %9255 = vmatpush3.msra.mxu0 %v9988_v39  ;;  %6131 = vmatpush1.msra.mxu1 %v6130_v58  ;;  %v7931_v29 = vsel %vm7929_vm9, %v7926_v21, %v10156_v25  ;;  %v10235_v57 = vand.u32 4294901760, %v10156_v25 }
 0x14c   : > { %6280 = vmatprep.subr.mxu1 %v10005_v45  ;;  %9256 = vmatprep.mubr.msk.f32.mxu0 %vm9433_vm2, %v9426_v6  ;;  %v7093_v26 = vand.u32 4294901760, %v7092_v22 }
 0x14d   : > { %9264 = vmatprep.subr.mxu0 %v9426_v6  ;;  %6164 = vmatprep.mubr.f32.mxu1 %v9426_v6 }
 0x14e   : > { %9257 = vmatmul.mubr.f32.vlgmr.msra.gmra.mxu0 %v9981_v38 }
 0x14f   : > { %9265 = vmatpush3.msra.mxu0 %v5623_v44  ;;  %9266 = vmatprep.mubr.msk.f32.mxu0 %vm9433_vm2, %v9426_v6 }
 0x150   : > { %6043 = vmatprep.subr.mxu0 %v10005_v45 }
 0x152   : > { %9267 = vmatmul.mubr.f32.vlgmr.msra.gmra.mxu0 %v9964_v34  ;;  %v10184_v34 = vand.u32 4294901760, %v7931_v29 }
 0x153   : > { %6045 = vmatpush1.msra.mxu0 %v10017_v47  ;;  %6078 = vmatprep.mubr.f32.mxu0 %v9426_v6 }
 0x154   : > { %6204 = vmatprep.subr.mxu0 %v10026_v49  ;;  %v10204_v41 = vsub.f32 %v7931_v29, %v10184_v34 }
 0x158   : > { %v5981_v63 = vpop.trf.xlu1 }
 0x159   : > { %v6010_v4 = vsel %vm250_vm1, %v5981_v63, 0 }
 0x15a   : > { %v10097_v5 = vand.u32 4294901760, %v6010_v4 }
 0x15c   : > { %v10103_v9 = vsub.f32 %v6010_v4, %v10097_v5  ;;  %6166 = vmatmul.mubr.f32.vlgmr.msra.gmra.mxu1 %v10097_v5 }
 0x15d   : > { %6282 = vmatpush1.msra.mxu1 %v10017_v47  ;;  %6315 = vmatprep.mubr.f32.mxu1 %v9426_v6 }
 0x15e   : > { %6434 = vmatprep.subr.mxu1 %v10005_v45  ;;  %v6081_v10 = vand.u32 4294901760, %v10103_v9 }
 0x160   : > { %6319 = vmatmul.mubr.f32.vlgmr.msra.gmra.mxu1 %v6081_v10  ;;  %v6082_v14 = vsub.f32 %v10103_v9, %v6081_v10 }
 0x161   : > { %6436 = vmatpush1.msra.mxu1 %v10017_v47  ;;  %6469 = vmatprep.mubr.f32.mxu1 %v9426_v6  ;;  %v8048_v47 = vand.u32 4294901760, %v10204_v41 }
 0x162   : > { %9279 = vmatprep.subr.mxu1 %v9426_v6  ;;  %v6083_v15 = vand.u32 4294901760, %v6082_v14 }
 0x164   : > { %6084 = vmatmul.mubr.f32.vlgmr.msra.gmra.mxu0 %v6083_v15  ;;  %6471 = vmatmul.mubr.f32.vlgmr.msra.gmra.mxu1 %v10097_v5 }
 0x165   : > { %6207 = vmatpush1.msra.mxu0 %v10034_v51  ;;  %9280 = vmatpush3.msra.mxu1 %v6588_v17 }
 0x166   : > { %6358 = vmatprep.subr.mxu0 %v6122_v53  ;;  %6240 = vmatprep.mubr.f32.mxu0 %v9426_v6  ;;  %v8049_v53 = vsub.f32 %v10204_v41, %v8048_v47 }
 0x167   : > { %9281 = vmatprep.mubr.msk.f32.mxu1 %vm9433_vm2, %v9426_v6  ;;  %9289 = vmatprep.subr.mxu1 %v9426_v6 }
 0x168   : > { %6243 = vmatmul.mubr.f32.vlgmr.msra.gmra.mxu0 %v10103_v9  ;;  %9282 = vmatmul.mubr.f32.vlgmr.msra.gmra.mxu1 %v10097_v5 }
 0x169   : > { %6362 = vmatpush1.msra.mxu0 %v6128_v54  ;;  %9290 = vmatpush3.msra.mxu1 %v6508_v59 }
 0x16a   : > { %6395 = vmatprep.mubr.f32.mxu0 %v9426_v6  ;;  %9274 = vmatprep.subr.mxu0 %v9426_v6 }
 0x16b   : > { %9291 = vmatprep.mubr.msk.f32.mxu1 %vm9433_vm2, %v9426_v6  ;;  %9299 = vmatprep.subr.mxu1 %v9426_v6 }
 0x16c   : > { %6397 = vmatmul.mubr.f32.vlgmr.msra.gmra.mxu0 %v10097_v5  ;;  %9292 = vmatmul.mubr.f32.vlgmr.msra.gmra.mxu1 %v6081_v10 }
 0x16d   : > { %9275 = vmatpush3.msra.mxu0 %v6508_v59  ;;  %9300 = vmatpush3.msra.mxu1 %v6508_v59 }
 0x16e   : > { %7088 = vmatprep.subr.mxu1 %v7087_v23  ;;  %9276 = vmatprep.mubr.msk.f32.mxu0 %vm9433_vm2, %v9426_v6 }
 0x16f   : > { %9284 = vmatprep.subr.mxu0 %v9426_v6  ;;  %9301 = vmatprep.mubr.msk.f32.mxu1 %vm9433_vm2, %v9426_v6  ;;  %v7924_v30 = vpop.permute.xlu1 %7923 }
 0x170   : > { %9277 = vmatmul.mubr.f32.vlgmr.msra.gmra.mxu0 %v6083_v15  ;;  %9302 = vmatmul.mubr.f32.vlgmr.msra.gmra.mxu1 %v10097_v5  ;;  %v7930_v35 = vsel %vm7929_vm9, %v7924_v30, %v7926_v21 }
 0x171   : > { %9285 = vmatpush3.msra.mxu0 %v10093_v62  ;;  %7094 = vmatpush1.msra.mxu1 %v7093_v26  ;;  %v10196_v38 = vand.u32 4294901760, %v7930_v35  ;;  %v8050_v62 = vand.u32 4294901760, %v8049_v53 }
 0x172   : > { %7243 = vmatprep.subr.mxu1 %v10100_v8  ;;  %9286 = vmatprep.mubr.msk.f32.mxu0 %vm9433_vm2, %v9426_v6 }
 0x173   : > { %v6944_v28 = vpop.trf.xlu0  ;;  %9294 = vmatprep.subr.mxu0 %v9426_v6  ;;  %7127 = vmatprep.mubr.f32.mxu1 %v9426_v6  ;;  %v10212_v45 = vsub.f32 %v7930_v35, %v10196_v38 }
 0x174   : > { %v6973_v31 = vsel %vm250_vm1, %v6944_v28, 0  ;;  %9287 = vmatmul.mubr.f32.vlgmr.msra.gmra.mxu0 %v10103_v9 }
 0x175   : > { %v10176_v32 = vand.u32 4294901760, %v6973_v31  ;;  %9295 = vmatpush3.msra.mxu0 %v6586_v7  ;;  %9296 = vmatprep.mubr.msk.f32.mxu0 %vm9433_vm2, %v9426_v6  ;;  %v8054_v49 = vand.u32 4294901760, %v10212_v45 }
 0x176   : > { %7006 = vmatprep.subr.mxu0 %v10100_v8 }
 0x177   : > { %v10188_v36 = vsub.f32 %v6973_v31, %v10176_v32  ;;  %7129 = vmatmul.mubr.f32.vlgmr.msra.gmra.mxu1 %v10176_v32  ;;  %v8055_v58 = vsub.f32 %v10212_v45, %v8054_v49 }
 0x178   : > { %7245 = vmatpush1.msra.mxu1 %v10110_v11  ;;  %9297 = vmatmul.mubr.f32.vlgmr.msra.gmra.mxu0 %v10097_v5 }
 0x179   : > { %7397 = vmatprep.subr.mxu1 %v10100_v8  ;;  %7008 = vmatpush1.msra.mxu0 %v10110_v11  ;;  %v7044_v37 = vand.u32 4294901760, %v10188_v36  ;;  %v10251_v8 = vsub.f32 %v10156_v25, %v10235_v57  ;;  %v8056_v9 = vand.u32 4294901760, %v8055_v58 }
 0x17a   : > { %7278 = vmatprep.mubr.f32.mxu1 %v9426_v6  ;;  %7167 = vmatprep.subr.mxu0 %v10116_v13  ;;  %v409_v39 = vpop.f32.mrf.mxu1 }
 0x17b   : > { %7282 = vmatmul.mubr.f32.vlgmr.msra.gmra.mxu1 %v7044_v37  ;;  %7041 = vmatprep.mubr.f32.mxu0 %v9426_v6  ;;  %v7045_v42 = vsub.f32 %v10188_v36, %v7044_v37 }
 0x17c   : > { %7399 = vmatpush1.msra.mxu1 %v10110_v11  ;;  %v411_v43 = vpop.f32.mrf.mxu1  ;;  %7432 = vmatprep.mubr.f32.mxu1 %v9426_v6 }
 0x17d   : > { %9309 = vmatprep.subr.mxu1 %v9426_v6  ;;  %v7046_v44 = vand.u32 4294901760, %v7045_v42 }
 0x17e   : > { %v562_v1 = vpop.f32.mrf.mxu1 }
 0x17f   : > { %7047 = vmatmul.mubr.f32.vlgmr.msra.gmra.mxu0 %v7046_v44  ;;  %7434 = vmatmul.mubr.f32.vlgmr.msra.gmra.mxu1 %v10176_v32 }
 0x180   : > { %7170 = vmatpush1.msra.mxu0 %v10123_v16  ;;  %9310 = vmatpush3.msra.mxu1 %v7551_v46  ;;  %v564_v48 = vpop.f32.mrf.mxu1 }
 0x181   : > { %7321 = vmatprep.subr.mxu0 %v7085_v18  ;;  %7203 = vmatprep.mubr.f32.mxu0 %v9426_v6 }
 0x182   : > { %9311 = vmatprep.mubr.msk.f32.mxu1 %vm9433_vm2, %v9426_v6  ;;  %9319 = vmatprep.subr.mxu1 %v9426_v6  ;;  %v327_v50 = vpop.f32.mrf.mxu0  ;;  %v714_v51 = vpop.f32.mrf.mxu1 }
 0x183   : > { %7206 = vmatmul.mubr.f32.vlgmr.msra.gmra.mxu0 %v10188_v36  ;;  %9312 = vmatmul.mubr.f32.vlgmr.msra.gmra.mxu1 %v10176_v32  ;;  %v410_v52 = vadd.f32 %v409_v39, %v327_v50 }
 0x184   : > { %7325 = vmatpush1.msra.mxu0 %v7091_v19  ;;  %9320 = vmatpush3.msra.mxu1 %v10152_v24  ;;  %v329_v54 = vpop.f32.mrf.mxu0  ;;  %v716_v55 = vpop.f32.mrf.mxu1  ;;  %v8512_v19 = vand.u32 4294901760, %v10251_v8 }
 0x185   : > { %v412_v56 = vadd.f32 %v411_v43, %v329_v54  ;;  %7358 = vmatprep.mubr.f32.mxu0 %v9426_v6  ;;  %9304 = vmatprep.subr.mxu0 %v9426_v6 }
 0x186   : > { %9321 = vmatprep.mubr.msk.f32.mxu1 %vm9433_vm2, %v9426_v6  ;;  %9329 = vmatprep.subr.mxu1 %v9426_v6  ;;  %v486_v59 = vpop.f32.mrf.mxu0  ;;  %v867_v60 = vpop.f32.mrf.mxu1 }
 0x187   : > { %7360 = vmatmul.mubr.f32.vlgmr.msra.gmra.mxu0 %v10176_v32  ;;  %9322 = vmatmul.mubr.f32.vlgmr.msra.gmra.mxu1 %v7044_v37  ;;  %v487_v61 = vadd.f32 %v486_v59, %v410_v52 }
 0x188   : > { %v7907_v63 = vpop.trf.xlu0  ;;  %9305 = vmatpush3.msra.mxu0 %v10152_v24  ;;  %9330 = vmatpush3.msra.mxu1 %v10152_v24  ;;  %v488_v0 = vpop.f32.mrf.mxu0 }
 0x189   : > { %v7936_v3 = vsel %vm250_vm1, %v7907_v63, 0  ;;  %8051 = vmatprep.subr.mxu1 %v8050_v62  ;;  %v489_v4 = vadd.f32 %v488_v0, %v412_v56  ;;  %v9103_v5 = vpop.f32.mrf.mxu1  ;;  %9306 = vmatprep.mubr.msk.f32.mxu0 %vm9433_vm2, %v9426_v6  ;;  %v563_v7 = vadd.f32 %v562_v1, %v487_v61 }
 0x18a   : > { %v10253_v2 = vand.u32 4294901760, %v7936_v3  ;;  %9314 = vmatprep.subr.mxu0 %v9426_v6  ;;  %9331 = vmatprep.mubr.msk.f32.mxu1 %vm9433_vm2, %v9426_v6  ;;  %v640_v10 = vpop.f32.mrf.mxu0 }
 0x18b   : > { %9307 = vmatmul.mubr.f32.vlgmr.msra.gmra.mxu0 %v7046_v44  ;;  %9332 = vmatmul.mubr.f32.vlgmr.msra.gmra.mxu1 %v10176_v32  ;;  %v641_v11 = vadd.f32 %v640_v10, %v563_v7  ;;  %v1015_v12 = vpop.f32.mrf.mxu1  ;;  %v565_v13 = vadd.f32 %v564_v48, %v489_v4 }
 0x18c   : > { %v10260_v14 = vsub.f32 %v7936_v3, %v10253_v2  ;;  %9315 = vmatpush3.msra.mxu0 %v10165_v27  ;;  %8057 = vmatpush1.msra.mxu1 %v8056_v9  ;;  %v642_v15 = vpop.f32.mrf.mxu0  ;;  %v8513_v27 = vsub.f32 %v10251_v8, %v8512_v19 }
 0x18d   : > { %8206 = vmatprep.subr.mxu1 %v10184_v34  ;;  %v643_v16 = vadd.f32 %v642_v15, %v565_v13  ;;  %v9113_v17 = vpop.f32.mrf.mxu1  ;;  %9316 = vmatprep.mubr.msk.f32.mxu0 %vm9433_vm2, %v9426_v6  ;;  %v715_v18 = vadd.f32 %v714_v51, %v641_v11 }
 0x18e   : > { %9324 = vmatprep.subr.mxu0 %v9426_v6  ;;  %8090 = vmatprep.mubr.f32.mxu1 %v9426_v6  ;;  %v791_v20 = vpop.f32.mrf.mxu0  ;;  %v8007_v21 = vand.u32 4294901760, %v10260_v14 }
 0x18f   : > { %9317 = vmatmul.mubr.f32.vlgmr.msra.gmra.mxu0 %v10188_v36  ;;  %8092 = vmatmul.mubr.f32.vlgmr.msra.gmra.mxu1 %v10253_v2  ;;  %v868_v22 = vadd.f32 %v867_v60, %v791_v20  ;;  %v1161_v23 = vpop.f32.mrf.mxu1  ;;  %v717_v24 = vadd.f32 %v716_v55, %v643_v16 }
 0x190   : > { %9325 = vmatpush3.msra.mxu0 %v7549_v33  ;;  %8208 = vmatpush1.msra.mxu1 %v10196_v38  ;;  %v9098_v25 = vpop.f32.mrf.mxu0  ;;  %v8008_v28 = vsub.f32 %v10260_v14, %v8007_v21 }
 0x191   : > { %7969 = vmatprep.subr.mxu0 %v10184_v34  ;;  %8360 = vmatprep.subr.mxu1 %v10184_v34  ;;  %v9123_v26 = vpop.f32.mrf.mxu1 }
 0x192   : > { %9326 = vmatprep.mubr.msk.f32.mxu0 %vm9433_vm2, %v9426_v6  ;;  %8241 = vmatprep.mubr.f32.mxu1 %v9426_v6  ;;  %v941_v29 = vpop.f32.mrf.mxu0  ;;  %v8009_v35 = vand.u32 4294901760, %v8008_v28 }
 0x193   : > { %9327 = vmatmul.mubr.f32.vlgmr.msra.gmra.mxu0 %v10176_v32  ;;  %8245 = vmatmul.mubr.f32.vlgmr.msra.gmra.mxu1 %v8007_v21  ;;  %v942_v30 = vadd.f32 %v941_v29, %v868_v22  ;;  %v1355_v31 = vpop.f32.mrf.mxu1  ;;  %v8514_v32 = vand.u32 4294901760, %v8513_v27 }
 0x194   : > { %7971 = vmatpush1.msra.mxu0 %v10196_v38  ;;  %8362 = vmatpush1.msra.mxu1 %v10196_v38  ;;  %v9108_v33 = vpop.f32.mrf.mxu0 }
 0x195   : > { %8130 = vmatprep.subr.mxu0 %v10204_v41  ;;  %v1357_v34 = vpop.f32.mrf.mxu1  ;;  %8004 = vmatprep.mubr.f32.mxu0 %v9426_v6  ;;  %v1016_v36 = vadd.f32 %v1015_v12, %v942_v30 }
 0x196   : > { %8395 = vmatprep.mubr.f32.mxu1 %v9426_v6  ;;  %9339 = vmatprep.subr.mxu1 %v9426_v6  ;;  %v1089_v37 = vpop.f32.mrf.mxu0 }
 0x197   : > { %8010 = vmatmul.mubr.f32.vlgmr.msra.gmra.mxu0 %v8009_v35  ;;  %8397 = vmatmul.mubr.f32.vlgmr.msra.gmra.mxu1 %v10253_v2  ;;  %v1090_v39 = vadd.f32 %v1089_v37, %v1016_v36  ;;  %v1508_v40 = vpop.f32.mrf.mxu1 }
 0x198   : > { %8133 = vmatpush1.msra.mxu0 %v10212_v45  ;;  %9340 = vmatpush3.msra.mxu1 %v8514_v32  ;;  %v9118_v38 = vpop.f32.mrf.mxu0 }
 0x199   : > { %8284 = vmatprep.subr.mxu0 %v8048_v47  ;;  %v1510_v42 = vpop.f32.mrf.mxu1  ;;  %8166 = vmatprep.mubr.f32.mxu0 %v9426_v6  ;;  %v1162_v43 = vadd.f32 %v1161_v23, %v1090_v39 }
 0x19a   : > { %9341 = vmatprep.mubr.msk.f32.mxu1 %vm9433_vm2, %v9426_v6  ;;  %9349 = vmatprep.subr.mxu1 %v9426_v6 }
 0x19b   : > { %8169 = vmatmul.mubr.f32.vlgmr.msra.gmra.mxu0 %v10260_v14  ;;  %9342 = vmatmul.mubr.f32.vlgmr.msra.gmra.mxu1 %v10253_v2  ;;  %v1273_v44 = vpop.f32.mrf.mxu0  ;;  %v1660_v46 = vpop.f32.mrf.mxu1 }
 0x19c   : > { %8288 = vmatpush1.msra.mxu0 %v8054_v49  ;;  %9350 = vmatpush3.msra.mxu1 %v10235_v57  ;;  %v1274_v41 = vadd.f32 %v1273_v44, %v715_v18 }
 0x19d   : > { %v1275_v1 = vpop.f32.mrf.mxu0  ;;  %v1662_v47 = vpop.f32.mrf.mxu1  ;;  %8321 = vmatprep.mubr.f32.mxu0 %v9426_v6  ;;  %9334 = vmatprep.subr.mxu0 %v9426_v6 }
 0x19e   : > { %v1276_v48 = vadd.f32 %v1275_v1, %v717_v24  ;;  %9351 = vmatprep.mubr.msk.f32.mxu1 %vm9433_vm2, %v9426_v6  ;;  %9359 = vmatprep.subr.mxu1 %v9426_v6  ;;  %v1356_v50 = vadd.f32 %v1355_v31, %v1274_v41 }
 0x19f   : > { %8323 = vmatmul.mubr.f32.vlgmr.msra.gmra.mxu0 %v10253_v2  ;;  %9352 = vmatmul.mubr.f32.vlgmr.msra.gmra.mxu1 %v8007_v21  ;;  %v1432_v45 = vpop.f32.mrf.mxu0 }
 0x1a0   : > { %9335 = vmatpush3.msra.mxu0 %v10235_v57  ;;  %9360 = vmatpush3.msra.mxu1 %v10235_v57  ;;  %v1433_v49 = vadd.f32 %v1432_v45, %v1356_v50  ;;  %v1813_v51 = vpop.f32.mrf.mxu1  ;;  %v1358_v52 = vadd.f32 %v1357_v34, %v1276_v48 }
 0x1a1   : > { %v1434_v53 = vpop.f32.mrf.mxu0  ;;  %9336 = vmatprep.mubr.msk.f32.mxu0 %vm9433_vm2, %v9426_v6  ;;  %9344 = vmatprep.subr.mxu0 %v9426_v6 }
 0x1a2   : > { %v1435_v54 = vadd.f32 %v1434_v53, %v1358_v52  ;;  %v9133_v55 = vpop.f32.mrf.mxu1  ;;  %9361 = vmatprep.mubr.msk.f32.mxu1 %vm9433_vm2, %v9426_v6  ;;  %v1509_v56 = vadd.f32 %v1508_v40, %v1433_v49 }
 0x1a3   : > { %9337 = vmatmul.mubr.f32.vlgmr.msra.gmra.mxu0 %v8009_v35  ;;  %9362 = vmatmul.mubr.f32.vlgmr.msra.gmra.mxu1 %v10253_v2 }
 0x1a4   : > { %9345 = vmatpush3.msra.mxu0 %v10251_v8  ;;  %v1586_v57 = vpop.f32.mrf.mxu0  ;;  %v1961_v58 = vpop.f32.mrf.mxu1  ;;  %v1511_v59 = vadd.f32 %v1510_v42, %v1435_v54  ;;  %9346 = vmatprep.mubr.msk.f32.mxu0 %vm9433_vm2, %v9426_v6 }
 0x1a5   : > { %v1587_v60 = vadd.f32 %v1586_v57, %v1509_v56  ;;  %9354 = vmatprep.subr.mxu0 %v9426_v6 }
 0x1a6   : > { %v1588_v61 = vpop.f32.mrf.mxu0  ;;  %v9143_v62 = vpop.f32.mrf.mxu1 }
 0x1a7   : > { %v1661_v63 = vadd.f32 %v1660_v46, %v1587_v60  ;;  %v1589_v0 = vadd.f32 %v1588_v61, %v1511_v59  ;;  %9347 = vmatmul.mubr.f32.vlgmr.msra.gmra.mxu0 %v10260_v14 }
 0x1a8   : > { %9355 = vmatpush3.msra.mxu0 %v8512_v19  ;;  %v1737_v3 = vpop.f32.mrf.mxu0  ;;  %v2107_v4 = vpop.f32.mrf.mxu1  ;;  %9356 = vmatprep.mubr.msk.f32.mxu0 %vm9433_vm2, %v9426_v6 }
 0x1a9   : > { %v1663_v5 = vadd.f32 %v1662_v47, %v1589_v0  ;;  %v1738_v7 = vadd.f32 %v1737_v3, %v1162_v43 }
 0x1aa   : > { %v9128_v9 = vpop.f32.mrf.mxu0  ;;  %v9153_v10 = vpop.f32.mrf.mxu1 }
 0x1ab   : > { %9357 = vmatmul.mubr.f32.vlgmr.msra.gmra.mxu0 %v10253_v2  ;;  %v1814_v11 = vadd.f32 %v1813_v51, %v1738_v7 }
 0x1ac   : > { %v1887_v12 = vpop.f32.mrf.mxu0 }
 0x1ad   : > { %v1888_v13 = vadd.f32 %v1887_v12, %v1814_v11  ;;  %v2315_v15 = vpop.f32.mrf.mxu1 }
 0x1ae   : > { %v9138_v16 = vpop.f32.mrf.mxu0 }
 0x1af   : > { %v2317_v14 = vpop.f32.mrf.mxu1  ;;  %v1962_v17 = vadd.f32 %v1961_v58, %v1888_v13 }
 0x1b0   : > { %v2035_v8 = vpop.f32.mrf.mxu0 }
 0x1b1   : > { %v2036_v18 = vadd.f32 %v2035_v8, %v1962_v17  ;;  %v2468_v19 = vpop.f32.mrf.mxu1 }
 0x1b2   : > { %v9148_v20 = vpop.f32.mrf.mxu0 }
 0x1b3   : > { %v2108_v21 = vadd.f32 %v2107_v4, %v2036_v18  ;;  %v2470_v22 = vpop.f32.mrf.mxu1 }
 0x1b4   : > { %v2233_v23 = vpop.f32.mrf.mxu0 }
 0x1b5   : > { %v2316_v24 = vadd.f32 %v2315_v15, %v2233_v23  ;;  %v2620_v25 = vpop.f32.mrf.mxu1 }
 0x1b6   : > { %v2235_v26 = vpop.f32.mrf.mxu0 }
 0x1b7   : > { %v2318_v28 = vadd.f32 %v2317_v14, %v2235_v26  ;;  %v2622_v29 = vpop.f32.mrf.mxu1 }
 0x1b9   : > { %v2392_v2 = vpop.f32.mrf.mxu0  ;;  %v2773_v27 = vpop.f32.mrf.mxu1 }
 0x1ba   : > { %v2393_v30 = vadd.f32 %v2392_v2, %v2316_v24 }
 0x1bb   : > { %v2394_v31 = vpop.f32.mrf.mxu0  ;;  %v9163_v33 = vpop.f32.mrf.mxu1 }
 0x1bc   : > { %v2395_v34 = vadd.f32 %v2394_v31, %v2318_v28  ;;  %v2469_v35 = vadd.f32 %v2468_v19, %v2393_v30 }
 0x1bd   : > { %v2546_v36 = vpop.f32.mrf.mxu0 }
 0x1be   : > { %v2547_v32 = vadd.f32 %v2546_v36, %v2469_v35  ;;  %v2921_v37 = vpop.f32.mrf.mxu1  ;;  %v2471_v39 = vadd.f32 %v2470_v22, %v2395_v34 }
 0x1bf   : > { %v2548_v40 = vpop.f32.mrf.mxu0 }
 0x1c0   : > { %v2621_v38 = vadd.f32 %v2620_v25, %v2547_v32  ;;  %v2549_v42 = vadd.f32 %v2548_v40, %v2471_v39  ;;  %v9173_v43 = vpop.f32.mrf.mxu1 }
 0x1c1   : > { %v2697_v44 = vpop.f32.mrf.mxu0 }
 0x1c2   : > { %v3071_v46 = vadd.f32 %v2621_v38, %v1661_v63  ;;  %v2623_v41 = vadd.f32 %v2622_v29, %v2549_v42  ;;  %v2774_v1 = vadd.f32 %v2773_v27, %v2697_v44  ;;  %v3067_v47 = vpop.f32.mrf.mxu1 }
 0x1c3   : > { %v9158_v48 = vpop.f32.mrf.mxu0 }
 0x1c4   : > { %v3072_v50 = vadd.f32 %v2623_v41, %v1663_v5  ;;  %v9183_v45 = vpop.f32.mrf.mxu1 }
 0x1c5   : > { %v2847_v49 = vpop.f32.mrf.mxu0 }
 0x1c6   : > { %v2848_v51 = vadd.f32 %v2847_v49, %v2774_v1  ;;  %v3278_v52 = vpop.f32.mrf.mxu1 }
 0x1c7   : > { %v9168_v53 = vpop.f32.mrf.mxu0 }
 0x1c8   : > { %v3280_v54 = vpop.f32.mrf.mxu1  ;;  %v2922_v55 = vadd.f32 %v2921_v37, %v2848_v51 }
 0x1c9   : > { %v2995_v56 = vpop.f32.mrf.mxu0 }
 0x1ca   : > { %v2996_v57 = vadd.f32 %v2995_v56, %v2922_v55  ;;  %v3431_v58 = vpop.f32.mrf.mxu1 }
 0x1cb   : > { %v9178_v59 = vpop.f32.mrf.mxu0 }
 0x1cc   : > { %v3068_v60 = vadd.f32 %v3067_v47, %v2996_v57  ;;  %v3433_v61 = vpop.f32.mrf.mxu1 }
 0x1ce   : > { %v3073_v62 = vadd.f32 %v3068_v60, %v2108_v21  ;;  %v3196_v63 = vpop.f32.mrf.mxu0  ;;  %v3583_v0 = vpop.f32.mrf.mxu1 }
 0x1cf   : > { %v3279_v3 = vadd.f32 %v3278_v52, %v3196_v63 }
 0x1d0   : > { %v3198_v4 = vpop.f32.mrf.mxu0  ;;  %v3585_v7 = vpop.f32.mrf.mxu1 }
 0x1d1   : > { %v3281_v5 = vadd.f32 %v3280_v54, %v3198_v4 }
 0x1d2   : > { %v3355_v9 = vpop.f32.mrf.mxu0  ;;  %v3736_v10 = vpop.f32.mrf.mxu1 }
 0x1d3   : > { %v3356_v11 = vadd.f32 %v3355_v9, %v3279_v3 }
 0x1d4   : > { %v3357_v12 = vpop.f32.mrf.mxu0  ;;  %v9193_v13 = vpop.f32.mrf.mxu1 }
 0x1d5   : > { %v3358_v15 = vadd.f32 %v3357_v12, %v3281_v5  ;;  %v3432_v16 = vadd.f32 %v3431_v58, %v3356_v11 }
 0x1d6   : > { %v3509_v14 = vpop.f32.mrf.mxu0  ;;  %v3884_v17 = vpop.f32.mrf.mxu1 }
 0x1d7   : > { %v3510_v8 = vadd.f32 %v3509_v14, %v3432_v16  ;;  %v3434_v18 = vadd.f32 %v3433_v61, %v3358_v15 }
 0x1d8   : > { %v3511_v19 = vpop.f32.mrf.mxu0  ;;  %v9203_v20 = vpop.f32.mrf.mxu1 }
 0x1d9   : > { %v3584_v21 = vadd.f32 %v3583_v0, %v3510_v8  ;;  %v3512_v22 = vadd.f32 %v3511_v19, %v3434_v18 }
 0x1da   : > { %v3660_v23 = vpop.f32.mrf.mxu0  ;;  %v4030_v24 = vpop.f32.mrf.mxu1 }
 0x1db   : > { %v4034_v25 = vadd.f32 %v3584_v21, %v3071_v46  ;;  %v3586_v26 = vadd.f32 %v3585_v7, %v3512_v22  ;;  %v3737_v28 = vadd.f32 %v3736_v10, %v3660_v23 }
 0x1dc   : > { %v9188_v29 = vpop.f32.mrf.mxu0  ;;  %v9213_v2 = vpop.f32.mrf.mxu1 }
 0x1dd   : > { %v4035_v27 = vadd.f32 %v3586_v26, %v3072_v50 }
 0x1de   : > { %v3810_v30 = vpop.f32.mrf.mxu0  ;;  %v4241_v31 = vpop.f32.mrf.mxu1 }
 0x1df   : > { %v3811_v33 = vadd.f32 %v3810_v30, %v3737_v28 }
 0x1e0   : > { %v9198_v34 = vpop.f32.mrf.mxu0  ;;  %v4243_v35 = vpop.f32.mrf.mxu1 }
 0x1e1   : > { %v3885_v36 = vadd.f32 %v3884_v17, %v3811_v33 }
 0x1e2   : > { %v3958_v32 = vpop.f32.mrf.mxu0  ;;  %v4394_v37 = vpop.f32.mrf.mxu1 }
 0x1e3   : > { %v3959_v39 = vadd.f32 %v3958_v32, %v3885_v36 }
 0x1e4   : > { %v9208_v40 = vpop.f32.mrf.mxu0  ;;  %v4396_v38 = vpop.f32.mrf.mxu1 }
 0x1e5   : > { %v4031_v42 = vadd.f32 %v4030_v24, %v3959_v39 }
 0x1e6   : > { %v4159_v43 = vpop.f32.mrf.mxu0  ;;  %v4546_v44 = vpop.f32.mrf.mxu1 }
 0x1e7   : > { %v4036_v46 = vadd.f32 %v4031_v42, %v3073_v62  ;;  %v4242_v41 = vadd.f32 %v4241_v31, %v4159_v43 }
 0x1e8   : > { %v4161_v1 = vpop.f32.mrf.mxu0  ;;  %v4548_v47 = vpop.f32.mrf.mxu1 }
 0x1e9   : > { %v4244_v48 = vadd.f32 %v4243_v35, %v4161_v1 }
 0x1ea   : > { %v4318_v50 = vpop.f32.mrf.mxu0  ;;  %v4699_v45 = vpop.f32.mrf.mxu1 }
 0x1eb   : > { %v4319_v49 = vadd.f32 %v4318_v50, %v4242_v41 }
 0x1ec   : > { %v4320_v51 = vpop.f32.mrf.mxu0  ;;  %v9223_v52 = vpop.f32.mrf.mxu1 }
 0x1ed   : > { %v4321_v54 = vadd.f32 %v4320_v51, %v4244_v48  ;;  %v4395_v55 = vadd.f32 %v4394_v37, %v4319_v49 }
 0x1ee   : > { %v4472_v56 = vpop.f32.mrf.mxu0  ;;  %v4847_v57 = vpop.f32.mrf.mxu1 }
 0x1ef   : > { %v4473_v58 = vadd.f32 %v4472_v56, %v4395_v55  ;;  %v4397_v59 = vadd.f32 %v4396_v38, %v4321_v54 }
 0x1f0   : > { %v4474_v60 = vpop.f32.mrf.mxu0  ;;  %v9233_v61 = vpop.f32.mrf.mxu1 }
 0x1f1   : > { %v4547_v62 = vadd.f32 %v4546_v44, %v4473_v58  ;;  %v4475_v63 = vadd.f32 %v4474_v60, %v4397_v59 }
 0x1f2   : > { %v4623_v0 = vpop.f32.mrf.mxu0  ;;  %v4993_v3 = vpop.f32.mrf.mxu1 }
 0x1f3   : > { %v4997_v4 = vadd.f32 %v4547_v62, %v4034_v25  ;;  %v4549_v7 = vadd.f32 %v4548_v47, %v4475_v63  ;;  %v4700_v5 = vadd.f32 %v4699_v45, %v4623_v0 }
 0x1f4   : > { %v9218_v9 = vpop.f32.mrf.mxu0  ;;  %v9243_v10 = vpop.f32.mrf.mxu1 }
 0x1f5   : > { %v4998_v11 = vadd.f32 %v4549_v7, %v4035_v27 }
 0x1f6   : > { %v4773_v12 = vpop.f32.mrf.mxu0  ;;  %v5204_v13 = vpop.f32.mrf.mxu1 }
 0x1f7   : > { %v4774_v15 = vadd.f32 %v4773_v12, %v4700_v5 }
 0x1f8   : > { %v9228_v6 = vpop.f32.mrf.mxu0  ;;  %v5206_v16 = vpop.f32.mrf.mxu1 }
 0x1f9   : > { %v4848_v14 = vadd.f32 %v4847_v57, %v4774_v15 }
 0x1fa   : > { %v4921_v17 = vpop.f32.mrf.mxu0  ;;  %v5357_v8 = vpop.f32.mrf.mxu1 }
 0x1fb   : > { %v4922_v18 = vadd.f32 %v4921_v17, %v4848_v14 }
 0x1fc   : > { %v9238_v19 = vpop.f32.mrf.mxu0  ;;  %v5359_v20 = vpop.f32.mrf.mxu1 }
 0x1fd   : > { %v4994_v21 = vadd.f32 %v4993_v3, %v4922_v18 }
 0x1fe   : > { %v5122_v22 = vpop.f32.mrf.mxu0  ;;  %v5509_v23 = vpop.f32.mrf.mxu1 }
 0x1ff   : > { %v4999_v24 = vadd.f32 %v4994_v21, %v4036_v46  ;;  %v5205_v25 = vadd.f32 %v5204_v13, %v5122_v22 }
 0x200   : > { %v5124_v26 = vpop.f32.mrf.mxu0  ;;  %v5511_v28 = vpop.f32.mrf.mxu1 }
 0x201   : > { %v5207_v29 = vadd.f32 %v5206_v16, %v5124_v26 }
 0x202   : > { %v5281_v2 = vpop.f32.mrf.mxu0  ;;  %v5662_v27 = vpop.f32.mrf.mxu1 }
 0x203   : > { %v5282_v30 = vadd.f32 %v5281_v2, %v5205_v25 }
 0x204   : > { %v5283_v31 = vpop.f32.mrf.mxu0  ;;  %v9253_v33 = vpop.f32.mrf.mxu1 }
 0x205   : > { %v5284_v34 = vadd.f32 %v5283_v31, %v5207_v29  ;;  %v5358_v35 = vadd.f32 %v5357_v8, %v5282_v30 }
 0x206   : > { %v5435_v36 = vpop.f32.mrf.mxu0  ;;  %v5810_v32 = vpop.f32.mrf.mxu1 }
 0x207   : > { %v5436_v37 = vadd.f32 %v5435_v36, %v5358_v35  ;;  %v5360_v39 = vadd.f32 %v5359_v20, %v5284_v34 }
 0x208   : > { %v5437_v40 = vpop.f32.mrf.mxu0  ;;  %v9263_v38 = vpop.f32.mrf.mxu1 }
 0x209   : > { %v5510_v42 = vadd.f32 %v5509_v23, %v5436_v37  ;;  %v5438_v43 = vadd.f32 %v5437_v40, %v5360_v39 }
 0x20a   : > { %v5586_v44 = vpop.f32.mrf.mxu0  ;;  %v5956_v46 = vpop.f32.mrf.mxu1 }
 0x20b   : > { %v5960_v41 = vadd.f32 %v5510_v42, %v4997_v4  ;;  %v5512_v1 = vadd.f32 %v5511_v28, %v5438_v43  ;;  %v5663_v47 = vadd.f32 %v5662_v27, %v5586_v44 }
 0x20c   : > { %v9248_v48 = vpop.f32.mrf.mxu0  ;;  %v9273_v50 = vpop.f32.mrf.mxu1 }
 0x20d   : > { %v5961_v45 = vadd.f32 %v5512_v1, %v4998_v11 }
 0x20e   : > { %v5736_v49 = vpop.f32.mrf.mxu0 }
 0x20f   : > { %v5737_v51 = vadd.f32 %v5736_v49, %v5663_v47 }
 0x210   : > { %v9258_v52 = vpop.f32.mrf.mxu0 }
 0x211   : > { %v5811_v54 = vadd.f32 %v5810_v32, %v5737_v51 }
 0x212   : > { %v5884_v55 = vpop.f32.mrf.mxu0 }
 0x213   : > { %v5885_v56 = vadd.f32 %v5884_v55, %v5811_v54 }
 0x214   : > { %v9268_v57 = vpop.f32.mrf.mxu0 }
 0x215   : > { %v5957_v58 = vadd.f32 %v5956_v46, %v5885_v56 }
 0x217   : > { %v10342_v59 = vadd.f32 %v5957_v58, %v4999_v24 }
 0x21c   : > { %v6167_v60 = vpop.f32.mrf.mxu1 }
 0x21e   : > { %v6169_v61 = vpop.f32.mrf.mxu1 }
 0x220   : > { %v6320_v62 = vpop.f32.mrf.mxu1 }
 0x222   : > { %v6322_v63 = vpop.f32.mrf.mxu1 }
 0x224   : > { %v6085_v0 = vpop.f32.mrf.mxu0  ;;  %v6472_v3 = vpop.f32.mrf.mxu1 }
 0x225   : > { %v6168_v5 = vadd.f32 %v6167_v60, %v6085_v0 }
 0x226   : > { %v6087_v4 = vpop.f32.mrf.mxu0  ;;  %v6474_v7 = vpop.f32.mrf.mxu1 }
 0x227   : > { %v6170_v11 = vadd.f32 %v6169_v61, %v6087_v4 }
 0x228   : > { %v6244_v9 = vpop.f32.mrf.mxu0  ;;  %v6625_v10 = vpop.f32.mrf.mxu1 }
 0x229   : > { %v6245_v12 = vadd.f32 %v6244_v9, %v6168_v5 }
 0x22a   : > { %v6246_v13 = vpop.f32.mrf.mxu0  ;;  %v9283_v15 = vpop.f32.mrf.mxu1 }
 0x22b   : > { %v6247_v6 = vadd.f32 %v6246_v13, %v6170_v11  ;;  %v6321_v16 = vadd.f32 %v6320_v62, %v6245_v12 }
 0x22c   : > { %v6398_v14 = vpop.f32.mrf.mxu0  ;;  %v10344_v17 = vpop.f32.mrf.mxu1 }
 0x22d   : > { %v6399_v8 = vadd.f32 %v6398_v14, %v6321_v16  ;;  %v6323_v18 = vadd.f32 %v6322_v63, %v6247_v6 }
 0x22e   : > { %v6400_v19 = vpop.f32.mrf.mxu0  ;;  %v9293_v20 = vpop.f32.mrf.mxu1 }
 0x22f   : > { %v6473_v21 = vadd.f32 %v6472_v3, %v6399_v8  ;;  %v6401_v22 = vadd.f32 %v6400_v19, %v6323_v18 }
 0x230   : > { %v6549_v23 = vpop.f32.mrf.mxu0  ;;  %v10346_v24 = vpop.f32.mrf.mxu1 }
 0x231   : > { %v10348_v25 = vadd.f32 %v6473_v21, %v5960_v41  ;;  %v6475_v26 = vadd.f32 %v6474_v7, %v6401_v22  ;;  %v6626_v11 = vadd.f32 %v6625_v10, %v6549_v23 }
 0x232   : > { %v9278_v28 = vpop.f32.mrf.mxu0  ;;  %v9303_v29 = vpop.f32.mrf.mxu1 }
 0x233   : > { %v10350_v2 = vadd.f32 %v6475_v26, %v5961_v45 }
 0x234   : > { %v6699_v27 = vpop.f32.mrf.mxu0 }
 0x235   : > { %v6700_v6 = vadd.f32 %v6699_v27, %v6626_v11 }
 0x236   : > { %v9288_v30 = vpop.f32.mrf.mxu0 }
 0x237   : > { %v7130_v31 = vpop.f32.mrf.mxu1 }
 0x238   : > { %v10352_v33 = vpop.f32.mrf.mxu0 }
 0x239   : > { %v7132_v34 = vpop.f32.mrf.mxu1 }
 0x23a   : > { %v9298_v35 = vpop.f32.mrf.mxu0 }
 0x23b   : > { %v7283_v36 = vpop.f32.mrf.mxu1 }
 0x23d   : > { %v7285_v32 = vpop.f32.mrf.mxu1 }
 0x23f   : > { %v7048_v37 = vpop.f32.mrf.mxu0  ;;  %v7435_v39 = vpop.f32.mrf.mxu1 }
 0x240   : > { %v7131_v55 = vadd.f32 %v7130_v31, %v7048_v37  ;;  %v6774_v31 = vadd.f32 %v10344_v17, %v6700_v6 }
 0x241   : > { %v7050_v40 = vpop.f32.mrf.mxu0  ;;  %v7437_v38 = vpop.f32.mrf.mxu1 }
 0x242   : > { %v7133_v58 = vadd.f32 %v7132_v34, %v7050_v40 }
 0x243   : > { %v7207_v42 = vpop.f32.mrf.mxu0  ;;  %v7588_v43 = vpop.f32.mrf.mxu1 }
 0x244   : > { %v7208_v60 = vadd.f32 %v7207_v42, %v7131_v55 }
 0x245   : > { %v7209_v44 = vpop.f32.mrf.mxu0  ;;  %v9313_v46 = vpop.f32.mrf.mxu1 }
 0x246   : > { %v7210_v63 = vadd.f32 %v7209_v44, %v7133_v58  ;;  %v7284_v4 = vadd.f32 %v7283_v36, %v7208_v60 }
 0x247   : > { %v7361_v41 = vpop.f32.mrf.mxu0  ;;  %v7736_v1 = vpop.f32.mrf.mxu1 }
 0x248   : > { %v7286_v9 = vadd.f32 %v7285_v32, %v7210_v63  ;;  %v7362_v16 = vadd.f32 %v7361_v41, %v7284_v4  ;;  %v6848_v41 = vadd.f32 %v10352_v33, %v6774_v31 }
 0x249   : > { %v7363_v47 = vpop.f32.mrf.mxu0  ;;  %v9323_v48 = vpop.f32.mrf.mxu1 }
 0x24a   : > { %v7364_v18 = vadd.f32 %v7363_v47, %v7286_v9  ;;  %v7436_v23 = vadd.f32 %v7435_v39, %v7362_v16  ;;  %v8860_v39 = vlaneseq }
 0x24b   : > { %v7512_v50 = vpop.f32.mrf.mxu0  ;;  %v10354_v45 = vpop.f32.mrf.mxu1 }
 0x24c   : > { %v7589_v19 = vadd.f32 %v7588_v43, %v7512_v50  ;;  %v7438_v35 = vadd.f32 %v7437_v38, %v7364_v18  ;;  %v7886_v47 = vadd.f32 %v7436_v23, %v10348_v25  ;;  %v9435_v50 = vmov 1983009808  }
 0x24d   : > { %v9308_v49 = vpop.f32.mrf.mxu0  ;;  %v9333_v51 = vpop.f32.mrf.mxu1 }
 0x24e   : > { %v7887_v48 = vadd.f32 %v7438_v35, %v10350_v2  ;;  %v8858_v49 = vunpack.c.l.s4 %v9435_v50 }
 0x24f   : > { %v7662_v52 = vpop.f32.mrf.mxu0  ;;  %v8093_v54 = vpop.f32.mrf.mxu1 }
 0x250   : > { %v7663_v28 = vadd.f32 %v7662_v52, %v7589_v19  ;;  %v8859_v2 = vunpack.c.0.s8 %v8858_v49 }
 0x251   : > { %v9318_v56 = vpop.f32.mrf.mxu0  ;;  %v8095_v57 = vpop.f32.mrf.mxu1 }
 0x252   : > { %v7737_v40 = vadd.f32 %v7736_v1, %v7663_v28 }
 0x253   : > { %v7810_v61 = vpop.f32.mrf.mxu0  ;;  %v8246_v62 = vpop.f32.mrf.mxu1 }
 0x254   : > { %v7811_v52 = vadd.f32 %v7810_v61, %v7737_v40 }
 0x255   : > { %v9328_v0 = vpop.f32.mrf.mxu0  ;;  %v8248_v3 = vpop.f32.mrf.mxu1 }
 0x256   : > { %v7883_v25 = vadd.f32 %v10354_v45, %v7811_v52 }
 0x257   : > { %v8011_v7 = vpop.f32.mrf.mxu0  ;;  %v8398_v5 = vpop.f32.mrf.mxu1 }
 0x258   : > { %v8094_v15 = vadd.f32 %v8093_v54, %v8011_v7 }
 0x259   : > { %v8013_v12 = vpop.f32.mrf.mxu0  ;;  %v8400_v13 = vpop.f32.mrf.mxu1 }
 0x25a   : > { %v8096_v20 = vadd.f32 %v8095_v57, %v8013_v12  ;;  %v6920_v57 = vadd.f32 %v10346_v24, %v6848_v41 }
 0x25b   : > { %v8170_v14 = vpop.f32.mrf.mxu0  ;;  %v8551_v8 = vpop.f32.mrf.mxu1 }
 0x25c   : > { %v8171_v21 = vadd.f32 %v8170_v14, %v8094_v15 }
 0x25d   : > { %v8172_v22 = vpop.f32.mrf.mxu0  ;;  %v9343_v26 = vpop.f32.mrf.mxu1 }
 0x25e   : > { %v8173_v29 = vadd.f32 %v8172_v22, %v8096_v20  ;;  %v8247_v30 = vadd.f32 %v8246_v62, %v8171_v21  ;;  %v8861_v62 = vshrl.u32 %v8860_v39, 7 }
 0x25f   : > { %v8324_v34 = vpop.f32.mrf.mxu0  ;;  %v8699_v10 = vpop.f32.mrf.mxu1 }
 0x260   : > { %v8325_v36 = vadd.f32 %v8324_v34, %v8247_v30  ;;  %v8249_v27 = vadd.f32 %v8248_v3, %v8173_v29  ;;  %v6925_v3 = vadd.f32 %v6920_v57, %v10342_v59 }
 0x261   : > { %v8326_v32 = vpop.f32.mrf.mxu0  ;;  %v9353_v37 = vpop.f32.mrf.mxu1 }
 0x262   : > { %v8399_v42 = vadd.f32 %v8398_v5, %v8325_v36  ;;  %v8327_v43 = vadd.f32 %v8326_v32, %v8249_v27  ;;  %v7888_v7 = vadd.f32 %v7883_v25, %v6925_v3  ;;  %v8862_v5 = vsub.s32 %v8859_v2, %v8861_v62 }
 0x263   : > { %v8475_v44 = vpop.f32.mrf.mxu0  ;;  %v8845_v46 = vpop.f32.mrf.mxu1 }
 0x264   : > { %v8401_v17 = vadd.f32 %v8400_v13, %v8327_v43  ;;  %v8849_v54 = vadd.f32 %v8399_v42, %v7886_v47  ;;  %v8552_v1 = vadd.f32 %v8551_v8, %v8475_v44  ;;  %v8852_v13 = vld [vmem:[%s10332_s22] sm:$0x3f] }
 0x265   : > { %v9338_v38 = vpop.f32.mrf.mxu0  ;;  %v9363_v51 = vpop.f32.mrf.mxu1 }
 0x266   : > { %v8850_v55 = vadd.f32 %v8401_v17, %v7887_v48 }
 0x267   : > { %v8625_v56 = vpop.f32.mrf.mxu0 }
 0x268   : > { %v8856_v58 = vcombine.low %v8849_v54, %v8850_v55  ;;  %v8626_v60 = vadd.f32 %v8625_v56, %v8552_v1 }
 0x269   : > { %v9348_v33 = vpop.f32.mrf.mxu0 }
 0x26a   : > { %v8700_v63 = vadd.f32 %v8699_v10, %v8626_v60  ;;  %v8863_v24 = vrot.slane %v8856_v58, %v8862_v5 }
 0x26b   : > { %v8773_v0 = vpop.f32.mrf.mxu0 }
 0x26c   : > { %v8774_v61 = vadd.f32 %v8773_v0, %v8700_v63 }
 0x26d   : > { %v9358_v4 = vpop.f32.mrf.mxu0 }
 0x26e   : > { %v8846_v9 = vadd.f32 %v8845_v46, %v8774_v61 }
 0x270   : > { %v8851_v11 = vadd.f32 %v8846_v9, %v7888_v7 }
 0x272   : > { %v8870_v12 = vrot.slane %v8851_v11, %v8862_v5 }
 0x274   : > { %v8871_v15 = vcombine.low %v8863_v24, %v8870_v12 }
 0x276   : > { %v8873_v6 = vadd.f32 %v8871_v15, %v8852_v13 }
 0x278   : > { %8879 = vst.msk [vmem:[%s10332_s22] sm:$0x3f] %vm10334_vm14, %v8873_v6 }
 0x279 PF: > { %s12_s11 = sadd.s32 1, %s9423_s11   ;;  %s10381_s9 = smov %s9419_s10 }
 0x27a   : > { %p9_p5 = scmp.ge.s32.totalorder %s12_s11, 4   ;;  %s10382_s10 = smov %s10384_s12 }
 0x27c   :  { %11 = sbr.rel (!%p9_p5) target bundleno = 2 (0x2), region = 73 }

</bundles_post_ra>
